<compile_context>
chip_gen: v7x
topology: tpu7x:2x2x1
jax: 0.10.0
libtpu: 0.0.40
codegen_flags: <defaults>
</compile_context>

<pallas_src>
import jax
import jax.numpy as jnp
from jax.experimental import pallas as pl
from jax.experimental.pallas import tpu as pltpu


def psa_kernel(x_ref,                 # (Bt, C, HW)
               wcq_ref,               # (C, 1)   ch_wq weight (bcq dropped)
               wcv_ref, bcv_ref,      # (C, C2), (1, C2)
               wczt_ref, bcz_ref,     # (C, C2) = wcz^T, (C, 1)
               g_ref, beta_ref,       # (C, 1), (C, 1)   LayerNorm affine
               wsq_ref, bsq_ref,      # (C, C2), (1, C2)
               wsv_ref, bsv_ref,      # (C, C2), (1, C2)
               o_ref):                # (Bt, C, HW)
    x = x_ref[...].astype(jnp.float32)

    # ---------------- channel-only branch (folded) ----------------
    # logits[b,hw] = sum_c x[b,c,hw] * wcq[c]   (sublane reduce -> lane-dense)
    logits = jnp.sum(x * wcq_ref[...], axis=1, keepdims=True)            # (Bt,1,HW)
    m = jnp.max(logits, axis=2, keepdims=True)                            # (Bt,1,1)
    e = jnp.exp(logits - m)                                               # (Bt,1,HW)
    inv_denom = 1.0 / jnp.sum(e, axis=2, keepdims=True)                   # exact (tiny)

    # fold #1: softmax-pooled x, in column (sublane) form.
    pooled = jnp.sum(x * e, axis=2, keepdims=True) * inv_denom            # (Bt,C,1)

    # Tiny matvecs as broadcast-multiply + reduce.  Two steps (wcv then wcz^T)
    # flip the vector back to column form for free -> no relayout needed.
    ch_wz = jnp.sum(pooled * wcv_ref[...], axis=1, keepdims=True) + bcv_ref[...]  # (Bt,1,C2)
    z = jnp.sum(ch_wz * wczt_ref[...], axis=2, keepdims=True) + bcz_ref[...]      # (Bt,C,1)

    # LayerNorm over C (eps=1e-5, biased variance), then sigmoid.
    mu = jnp.mean(z, axis=1, keepdims=True)
    zc = z - mu
    var = jnp.mean(zc * zc, axis=1, keepdims=True)
    zn = zc * jax.lax.rsqrt(var + 1e-5) * g_ref[...] + beta_ref[...]
    ch_w = jax.nn.sigmoid(zn)                                             # (Bt,C,1)

    ch_out = ch_w * x                                                     # (Bt,C,HW)

    # ---------------- spatial-only branch (folded) ----------------
    # fold #2: mean_hw(sp_wq(ch_out)) = wsq.(ch_w * mean_hw(x)) + bsq
    x_mean = jnp.mean(x, axis=2, keepdims=True)                           # (Bt,C,1)
    com = ch_w * x_mean                                                   # (Bt,C,1)
    sq = jnp.sum(com * wsq_ref[...], axis=1, keepdims=True) + bsq_ref[...]  # (Bt,1,C2)

    m2 = jnp.max(sq, axis=2, keepdims=True)
    e2 = jnp.exp(sq - m2)
    q = e2 / jnp.sum(e2, axis=2, keepdims=True)                           # (Bt,1,C2)

    # fold #3: sp_wz = (wsv.q) . ch_out + (bsv.q)
    v = jnp.sum(q * wsv_ref[...], axis=2, keepdims=True)                  # (Bt,C,1)
    b_sc = jnp.sum(q * bsv_ref[...], axis=2, keepdims=True)               # (Bt,1,1)
    sp_wz = jnp.sum(ch_out * v, axis=1, keepdims=True) + b_sc             # (Bt,1,HW)
    sp_w = jax.nn.sigmoid(sp_wz)

    o_ref[...] = (sp_w * ch_out).astype(o_ref.dtype)


def _largest_divisor_leq(n, cap):
    best = 1
    for d in range(1, n + 1):
        if n % d == 0 and d <= cap:
            best = d
    return best


def _tpu_generation_info():
    """Best-effort (physical VMEM bytes per TensorCore, TCs sharing the grid)."""
    vmem = 128 << 20
    cores = 1
    try:
        kind = jax.devices()[0].device_kind.lower()
    except Exception:
        kind = ""
    if "v7" in kind:
        vmem, cores = 64 << 20, 2           # 2 TCs / chip, smaller VMEM
    elif ("v4" in kind) or ("v5p" in kind):
        vmem, cores = 128 << 20, 2          # megacore
    try:  # refine VMEM size if the query is available on this jax version
        info = pltpu.get_tpu_info()
        vmem = int(getattr(info, "vmem_capacity_bytes", vmem))
    except Exception:
        pass
    return vmem, cores


def _choose_block(B, C, HW, vmem_phys, num_cores):
    """Pick batches-per-step Bt and an explicit scoped-VMEM limit."""
    # Per fused batch: 2x input block + 2x output block (double-buffering)
    # plus live f32 intermediates (ch_out, fused temporaries, final product).
    per_batch = 8 * C * HW * 4
    vmem_limit = int(vmem_phys * 0.75)                     # requested scoped limit
    block_budget = min(int(vmem_limit * 0.65), 56 << 20) - (1 << 20)  # weights margin
    cap = max(1, block_budget // max(per_batch, 1))
    if num_cores >= 2 and B > 1:
        # Keep >= num_cores grid steps so every TensorCore gets work.
        cap = min(cap, max(1, B // num_cores))
    bt = _largest_divisor_leq(B, cap)
    return bt, vmem_limit


def sequential_polarized_self_attention(x_nchw, params):
    """x_nchw: (B, C, H, W) float32. Returns (B, C, H, W)."""
    B, C, H, W = x_nchw.shape
    HW = H * W

    # Free reshape (no transpose): NCHW -> (B, C, HW), HW on the lane dim.
    x = x_nchw.reshape(B, C, HW)

    (wcv, bcv, wcq, bcq, wcz, bcz, g, beta, wsv, bsv, wsq, bsq) = params
    del bcq  # softmax over HW is shift-invariant -> bcq is a no-op

    # Tiny one-time weight re-orientations (outside the kernel).
    wcq_col = wcq                              # (C, 1)
    wczt = jnp.transpose(wcz)                  # (C2, C) -> (C, C2)
    bcz_col = jnp.transpose(bcz)               # (1, C)  -> (C, 1)
    g_col = jnp.transpose(g)                   # (1, C)  -> (C, 1)
    beta_col = jnp.transpose(beta)             # (1, C)  -> (C, 1)

    vmem_phys, num_cores = _tpu_generation_info()
    Bt, vmem_limit = _choose_block(B, C, HW, vmem_phys, num_cores)
    grid = (B // Bt,)

    def full_spec(arr):
        nd = arr.ndim
        return pl.BlockSpec(arr.shape, lambda b, _nd=nd: (0,) * _nd)

    grid_spec = pltpu.PrefetchScalarGridSpec(
        num_scalar_prefetch=0,
        grid=grid,
        in_specs=[
            pl.BlockSpec((Bt, C, HW), lambda b: (b, 0, 0)),
            full_spec(wcq_col),
            full_spec(wcv), full_spec(bcv),
            full_spec(wczt), full_spec(bcz_col),
            full_spec(g_col), full_spec(beta_col),
            full_spec(wsq), full_spec(bsq),
            full_spec(wsv), full_spec(bsv),
        ],
        out_specs=pl.BlockSpec((Bt, C, HW), lambda b: (b, 0, 0)),
    )

    out = pl.pallas_call(
        psa_kernel,
        out_shape=jax.ShapeDtypeStruct((B, C, HW), x.dtype),
        grid_spec=grid_spec,
        compiler_params=pltpu.CompilerParams(
            dimension_semantics=("parallel",),
            vmem_limit_bytes=vmem_limit),
    )(x, wcq_col, wcv, bcv, wczt, bcz_col, g_col, beta_col,
      wsq, bsq, wsv, bsv)

    # Free reshape back to NCHW.
    return out.reshape(B, C, H, W)


def make_params(key, C):
    """Deterministic parameter init. 1x1 conv weights stored as (Cin, Cout)."""
    C2 = C // 2
    ks = jax.random.split(key, 10)
    s = 0.1
    wcv = s * jax.random.normal(ks[0], (C, C2), jnp.float32)
    bcv = s * jax.random.normal(ks[1], (1, C2), jnp.float32)
    wcq = s * jax.random.normal(ks[2], (C, 1), jnp.float32)
    bcq = s * jax.random.normal(ks[3], (1, 1), jnp.float32)
    wcz = s * jax.random.normal(ks[4], (C2, C), jnp.float32)
    bcz = s * jax.random.normal(ks[5], (1, C), jnp.float32)
    g = jnp.ones((1, C), jnp.float32)      # nn.LayerNorm default weight
    beta = jnp.zeros((1, C), jnp.float32)  # nn.LayerNorm default bias
    wsv = s * jax.random.normal(ks[6], (C, C2), jnp.float32)
    bsv = s * jax.random.normal(ks[7], (1, C2), jnp.float32)
    wsq = s * jax.random.normal(ks[8], (C, C2), jnp.float32)
    bsq = s * jax.random.normal(ks[9], (1, C2), jnp.float32)
    return (wcv, bcv, wcq, bcq, wcz, bcz, g, beta, wsv, bsv, wsq, bsq)


def reference_forward(x_nchw, params):
    """Pure-JAX re-implementation of the PyTorch forward (for validation)."""
    (wcv, bcv, wcq, bcq, wcz, bcz, g, beta, wsv, bsv, wsq, bsq) = params
    B, C, H, W = x_nchw.shape
    HW = H * W
    x = jnp.transpose(x_nchw, (0, 2, 3, 1)).reshape(B, HW, C)   # (B, HW, C)

    ch_wv = x @ wcv + bcv                                       # (B, HW, C/2)
    ch_wq = x @ wcq + bcq                                       # (B, HW, 1)
    ch_wq = jax.nn.softmax(ch_wq, axis=1)
    ch_wz = jnp.sum(ch_wv * ch_wq, axis=1, keepdims=True)       # (B, 1, C/2)
    z = ch_wz @ wcz + bcz                                       # (B, 1, C)
    mu = jnp.mean(z, axis=-1, keepdims=True)
    var = jnp.mean((z - mu) ** 2, axis=-1, keepdims=True)
    zn = (z - mu) / jnp.sqrt(var + 1e-5) * g + beta
    ch_weight = jax.nn.sigmoid(zn)                              # (B, 1, C)
    ch_out = ch_weight * x                                      # (B, HW, C)

    sp_wv = ch_out @ wsv + bsv                                  # (B, HW, C/2)
    sp_wq = ch_out @ wsq + bsq                                  # (B, HW, C/2)
    sp_wq = jnp.mean(sp_wq, axis=1, keepdims=True)              # (B, 1, C/2)
    sp_wq = jax.nn.softmax(sp_wq, axis=-1)
    sp_wz = jnp.sum(sp_wv * sp_wq, axis=-1, keepdims=True)      # (B, HW, 1)
    sp_weight = jax.nn.sigmoid(sp_wz)
    out = sp_weight * ch_out                                    # (B, HW, C)
    return jnp.transpose(out.reshape(B, H, W, C), (0, 3, 1, 2))


if __name__ == "__main__":
    B, C, H, W = 2, 32, 16, 16
    key = jax.random.PRNGKey(0)
    kx, kp = jax.random.split(key)
    x = jax.random.normal(kx, (B, C, H, W), jnp.float32)
    params = make_params(kp, C)

    out = sequential_polarized_self_attention(x, params)
    out = jax.block_until_ready(out)

    ref = jax.block_until_ready(reference_forward(x, params))
    assert out.shape == (B, C, H, W)
    # exact softmax denominators now; only reassociation-level differences remain
    assert jnp.allclose(out, ref, atol=1e-3, rtol=1e-3), "mismatch vs reference"

    print("KERNEL_OK")
</pallas_src>

<mosaic_0001>
module attributes {stable_mosaic.version = 11 : i64} {
  func.func @psa_kernel(%arg0: i32, %arg1: memref<2x32x256xf32, #tpu.memory_space<vmem>>, %arg2: memref<32x1xf32, #tpu.memory_space<vmem>>, %arg3: memref<32x16xf32, #tpu.memory_space<vmem>>, %arg4: memref<1x16xf32, #tpu.memory_space<vmem>>, %arg5: memref<32x16xf32, #tpu.memory_space<vmem>>, %arg6: memref<32x1xf32, #tpu.memory_space<vmem>>, %arg7: memref<32x1xf32, #tpu.memory_space<vmem>>, %arg8: memref<32x1xf32, #tpu.memory_space<vmem>>, %arg9: memref<32x16xf32, #tpu.memory_space<vmem>>, %arg10: memref<1x16xf32, #tpu.memory_space<vmem>>, %arg11: memref<32x16xf32, #tpu.memory_space<vmem>>, %arg12: memref<1x16xf32, #tpu.memory_space<vmem>>, %arg13: memref<2x32x256xf32, #tpu.memory_space<vmem>>) attributes {dimension_semantics = [#tpu.dimension_semantics<parallel>], iteration_bounds = array<i64: 1>, scalar_prefetch = 0 : i64, scratch_operands = 0 : i64, tpu.core_type = #tpu.core_type<tc>, window_params = [{transform_indices = @transform_0, window_bounds = array<i64: 2, 32, 256>}, {pipeline_mode = #tpu.pipeline_mode<synchronous>, transform_indices = @transform_1, window_bounds = array<i64: 32, 1>}, {pipeline_mode = #tpu.pipeline_mode<synchronous>, transform_indices = @transform_2, window_bounds = array<i64: 32, 16>}, {pipeline_mode = #tpu.pipeline_mode<synchronous>, transform_indices = @transform_3, window_bounds = array<i64: 1, 16>}, {pipeline_mode = #tpu.pipeline_mode<synchronous>, transform_indices = @transform_4, window_bounds = array<i64: 32, 16>}, {pipeline_mode = #tpu.pipeline_mode<synchronous>, transform_indices = @transform_5, window_bounds = array<i64: 32, 1>}, {pipeline_mode = #tpu.pipeline_mode<synchronous>, transform_indices = @transform_6, window_bounds = array<i64: 32, 1>}, {pipeline_mode = #tpu.pipeline_mode<synchronous>, transform_indices = @transform_7, window_bounds = array<i64: 32, 1>}, {pipeline_mode = #tpu.pipeline_mode<synchronous>, transform_indices = @transform_8, window_bounds = array<i64: 32, 16>}, {pipeline_mode = #tpu.pipeline_mode<synchronous>, transform_indices = @transform_9, window_bounds = array<i64: 1, 16>}, {pipeline_mode = #tpu.pipeline_mode<synchronous>, transform_indices = @transform_10, window_bounds = array<i64: 32, 16>}, {pipeline_mode = #tpu.pipeline_mode<synchronous>, transform_indices = @transform_11, window_bounds = array<i64: 1, 16>}, {transform_indices = @transform_12, window_bounds = array<i64: 2, 32, 256>}]} {
    %c0 = arith.constant 0 : index
    %c0_0 = arith.constant 0 : index
    %c0_1 = arith.constant 0 : index
    %0 = vector.load %arg1[%c0, %c0_0, %c0_1] : memref<2x32x256xf32, #tpu.memory_space<vmem>>, vector<2x32x256xf32>
    %c0_2 = arith.constant 0 : index
    %c0_3 = arith.constant 0 : index
    %1 = vector.load %arg2[%c0_2, %c0_3] : memref<32x1xf32, #tpu.memory_space<vmem>>, vector<32x1xf32>
    %2 = vector.shape_cast %1 : vector<32x1xf32> to vector<1x32x1xf32>
    %3 = vector.broadcast %2 : vector<1x32x1xf32> to vector<2x32x256xf32>
    %4 = arith.mulf %0, %3 : vector<2x32x256xf32>
    %cst = arith.constant dense<0.000000e+00> : vector<2x256xf32>
    %5 = vector.multi_reduction <add>, %4, %cst [1] : vector<2x32x256xf32> to vector<2x256xf32>
    %6 = vector.shape_cast %5 : vector<2x256xf32> to vector<2x1x256xf32>
    %cst_4 = arith.constant dense<0xFF800000> : vector<2x1xf32>
    %7 = vector.multi_reduction <maximumf>, %6, %cst_4 [2] : vector<2x1x256xf32> to vector<2x1xf32>
    %8 = vector.shape_cast %7 : vector<2x1xf32> to vector<2x1x1xf32>
    %9 = vector.broadcast %8 : vector<2x1x1xf32> to vector<2x1x256xf32>
    %10 = arith.subf %6, %9 : vector<2x1x256xf32>
    %11 = math.exp %10 : vector<2x1x256xf32>
    %cst_5 = arith.constant dense<0.000000e+00> : vector<2x1xf32>
    %12 = vector.multi_reduction <add>, %11, %cst_5 [2] : vector<2x1x256xf32> to vector<2x1xf32>
    %13 = vector.shape_cast %12 : vector<2x1xf32> to vector<2x1x1xf32>
    %cst_6 = arith.constant 1.000000e+00 : f32
    %14 = vector.broadcast %cst_6 : f32 to vector<2x1x1xf32>
    %15 = arith.divf %14, %13 : vector<2x1x1xf32>
    %16 = vector.broadcast %11 : vector<2x1x256xf32> to vector<2x32x256xf32>
    %17 = arith.mulf %0, %16 : vector<2x32x256xf32>
    %cst_7 = arith.constant dense<0.000000e+00> : vector<2x32xf32>
    %18 = vector.multi_reduction <add>, %17, %cst_7 [2] : vector<2x32x256xf32> to vector<2x32xf32>
    %19 = vector.shape_cast %18 : vector<2x32xf32> to vector<2x32x1xf32>
    %20 = vector.broadcast %15 : vector<2x1x1xf32> to vector<2x32x1xf32>
    %21 = arith.mulf %19, %20 : vector<2x32x1xf32>
    %c0_8 = arith.constant 0 : index
    %c0_9 = arith.constant 0 : index
    %22 = vector.load %arg3[%c0_8, %c0_9] : memref<32x16xf32, #tpu.memory_space<vmem>>, vector<32x16xf32>
    %23 = vector.shape_cast %22 : vector<32x16xf32> to vector<1x32x16xf32>
    %24 = vector.broadcast %21 : vector<2x32x1xf32> to vector<2x32x16xf32>
    %25 = vector.broadcast %23 : vector<1x32x16xf32> to vector<2x32x16xf32>
    %26 = arith.mulf %24, %25 : vector<2x32x16xf32>
    %cst_10 = arith.constant dense<0.000000e+00> : vector<2x16xf32>
    %27 = vector.multi_reduction <add>, %26, %cst_10 [1] : vector<2x32x16xf32> to vector<2x16xf32>
    %28 = vector.shape_cast %27 : vector<2x16xf32> to vector<2x1x16xf32>
    %c0_11 = arith.constant 0 : index
    %c0_12 = arith.constant 0 : index
    %29 = vector.load %arg4[%c0_11, %c0_12] : memref<1x16xf32, #tpu.memory_space<vmem>>, vector<1x16xf32>
    %30 = vector.shape_cast %29 : vector<1x16xf32> to vector<1x1x16xf32>
    %31 = vector.broadcast %30 : vector<1x1x16xf32> to vector<2x1x16xf32>
    %32 = arith.addf %28, %31 : vector<2x1x16xf32>
    %c0_13 = arith.constant 0 : index
    %c0_14 = arith.constant 0 : index
    %33 = vector.load %arg5[%c0_13, %c0_14] : memref<32x16xf32, #tpu.memory_space<vmem>>, vector<32x16xf32>
    %34 = vector.shape_cast %33 : vector<32x16xf32> to vector<1x32x16xf32>
    %35 = vector.broadcast %32 : vector<2x1x16xf32> to vector<2x32x16xf32>
    %36 = vector.broadcast %34 : vector<1x32x16xf32> to vector<2x32x16xf32>
    %37 = arith.mulf %35, %36 : vector<2x32x16xf32>
    %cst_15 = arith.constant dense<0.000000e+00> : vector<2x32xf32>
    %38 = vector.multi_reduction <add>, %37, %cst_15 [2] : vector<2x32x16xf32> to vector<2x32xf32>
    %39 = vector.shape_cast %38 : vector<2x32xf32> to vector<2x32x1xf32>
    %c0_16 = arith.constant 0 : index
    %c0_17 = arith.constant 0 : index
    %40 = vector.load %arg6[%c0_16, %c0_17] : memref<32x1xf32, #tpu.memory_space<vmem>>, vector<32x1xf32>
    %41 = vector.shape_cast %40 : vector<32x1xf32> to vector<1x32x1xf32>
    %42 = vector.broadcast %41 : vector<1x32x1xf32> to vector<2x32x1xf32>
    %43 = arith.addf %39, %42 : vector<2x32x1xf32>
    %cst_18 = arith.constant dense<0.000000e+00> : vector<2x1xf32>
    %44 = vector.multi_reduction <add>, %43, %cst_18 [1] : vector<2x32x1xf32> to vector<2x1xf32>
    %45 = vector.shape_cast %44 : vector<2x1xf32> to vector<2x1x1xf32>
    %cst_19 = arith.constant 3.200000e+01 : f32
    %46 = vector.broadcast %cst_19 : f32 to vector<2x1x1xf32>
    %47 = arith.divf %45, %46 : vector<2x1x1xf32>
    %48 = vector.broadcast %47 : vector<2x1x1xf32> to vector<2x32x1xf32>
    %49 = arith.subf %43, %48 : vector<2x32x1xf32>
    %50 = arith.mulf %49, %49 : vector<2x32x1xf32>
    %cst_20 = arith.constant dense<0.000000e+00> : vector<2x1xf32>
    %51 = vector.multi_reduction <add>, %50, %cst_20 [1] : vector<2x32x1xf32> to vector<2x1xf32>
    %52 = vector.shape_cast %51 : vector<2x1xf32> to vector<2x1x1xf32>
    %cst_21 = arith.constant 3.200000e+01 : f32
    %53 = vector.broadcast %cst_21 : f32 to vector<2x1x1xf32>
    %54 = arith.divf %52, %53 : vector<2x1x1xf32>
    %cst_22 = arith.constant 9.99999974E-6 : f32
    %55 = vector.broadcast %cst_22 : f32 to vector<2x1x1xf32>
    %56 = arith.addf %54, %55 : vector<2x1x1xf32>
    %57 = math.rsqrt %56 : vector<2x1x1xf32>
    %58 = vector.broadcast %57 : vector<2x1x1xf32> to vector<2x32x1xf32>
    %59 = arith.mulf %49, %58 : vector<2x32x1xf32>
    %c0_23 = arith.constant 0 : index
    %c0_24 = arith.constant 0 : index
    %60 = vector.load %arg7[%c0_23, %c0_24] : memref<32x1xf32, #tpu.memory_space<vmem>>, vector<32x1xf32>
    %61 = vector.shape_cast %60 : vector<32x1xf32> to vector<1x32x1xf32>
    %62 = vector.broadcast %61 : vector<1x32x1xf32> to vector<2x32x1xf32>
    %63 = arith.mulf %59, %62 : vector<2x32x1xf32>
    %c0_25 = arith.constant 0 : index
    %c0_26 = arith.constant 0 : index
    %64 = vector.load %arg8[%c0_25, %c0_26] : memref<32x1xf32, #tpu.memory_space<vmem>>, vector<32x1xf32>
    %65 = vector.shape_cast %64 : vector<32x1xf32> to vector<1x32x1xf32>
    %66 = vector.broadcast %65 : vector<1x32x1xf32> to vector<2x32x1xf32>
    %67 = arith.addf %63, %66 : vector<2x32x1xf32>
    %68 = arith.negf %67 : vector<2x32x1xf32>
    %69 = math.exp %68 : vector<2x32x1xf32>
    %cst_27 = arith.constant 1.000000e+00 : f32
    %70 = vector.broadcast %cst_27 : f32 to vector<2x32x1xf32>
    %71 = arith.addf %70, %69 : vector<2x32x1xf32>
    %72 = arith.divf %70, %71 : vector<2x32x1xf32>
    %73 = vector.broadcast %72 : vector<2x32x1xf32> to vector<2x32x256xf32>
    %74 = arith.mulf %73, %0 : vector<2x32x256xf32>
    %cst_28 = arith.constant dense<0.000000e+00> : vector<2x32xf32>
    %75 = vector.multi_reduction <add>, %0, %cst_28 [2] : vector<2x32x256xf32> to vector<2x32xf32>
    %76 = vector.shape_cast %75 : vector<2x32xf32> to vector<2x32x1xf32>
    %cst_29 = arith.constant 2.560000e+02 : f32
    %77 = vector.broadcast %cst_29 : f32 to vector<2x32x1xf32>
    %78 = arith.divf %76, %77 : vector<2x32x1xf32>
    %79 = arith.mulf %72, %78 : vector<2x32x1xf32>
    %c0_30 = arith.constant 0 : index
    %c0_31 = arith.constant 0 : index
    %80 = vector.load %arg9[%c0_30, %c0_31] : memref<32x16xf32, #tpu.memory_space<vmem>>, vector<32x16xf32>
    %81 = vector.shape_cast %80 : vector<32x16xf32> to vector<1x32x16xf32>
    %82 = vector.broadcast %79 : vector<2x32x1xf32> to vector<2x32x16xf32>
    %83 = vector.broadcast %81 : vector<1x32x16xf32> to vector<2x32x16xf32>
    %84 = arith.mulf %82, %83 : vector<2x32x16xf32>
    %cst_32 = arith.constant dense<0.000000e+00> : vector<2x16xf32>
    %85 = vector.multi_reduction <add>, %84, %cst_32 [1] : vector<2x32x16xf32> to vector<2x16xf32>
    %86 = vector.shape_cast %85 : vector<2x16xf32> to vector<2x1x16xf32>
    %c0_33 = arith.constant 0 : index
    %c0_34 = arith.constant 0 : index
    %87 = vector.load %arg10[%c0_33, %c0_34] : memref<1x16xf32, #tpu.memory_space<vmem>>, vector<1x16xf32>
    %88 = vector.shape_cast %87 : vector<1x16xf32> to vector<1x1x16xf32>
    %89 = vector.broadcast %88 : vector<1x1x16xf32> to vector<2x1x16xf32>
    %90 = arith.addf %86, %89 : vector<2x1x16xf32>
    %cst_35 = arith.constant dense<0xFF800000> : vector<2x1xf32>
    %91 = vector.multi_reduction <maximumf>, %90, %cst_35 [2] : vector<2x1x16xf32> to vector<2x1xf32>
    %92 = vector.shape_cast %91 : vector<2x1xf32> to vector<2x1x1xf32>
    %93 = vector.broadcast %92 : vector<2x1x1xf32> to vector<2x1x16xf32>
    %94 = arith.subf %90, %93 : vector<2x1x16xf32>
    %95 = math.exp %94 : vector<2x1x16xf32>
    %cst_36 = arith.constant dense<0.000000e+00> : vector<2x1xf32>
    %96 = vector.multi_reduction <add>, %95, %cst_36 [2] : vector<2x1x16xf32> to vector<2x1xf32>
    %97 = vector.shape_cast %96 : vector<2x1xf32> to vector<2x1x1xf32>
    %98 = vector.broadcast %97 : vector<2x1x1xf32> to vector<2x1x16xf32>
    %99 = arith.divf %95, %98 : vector<2x1x16xf32>
    %c0_37 = arith.constant 0 : index
    %c0_38 = arith.constant 0 : index
    %100 = vector.load %arg11[%c0_37, %c0_38] : memref<32x16xf32, #tpu.memory_space<vmem>>, vector<32x16xf32>
    %101 = vector.shape_cast %100 : vector<32x16xf32> to vector<1x32x16xf32>
    %102 = vector.broadcast %99 : vector<2x1x16xf32> to vector<2x32x16xf32>
    %103 = vector.broadcast %101 : vector<1x32x16xf32> to vector<2x32x16xf32>
    %104 = arith.mulf %102, %103 : vector<2x32x16xf32>
    %cst_39 = arith.constant dense<0.000000e+00> : vector<2x32xf32>
    %105 = vector.multi_reduction <add>, %104, %cst_39 [2] : vector<2x32x16xf32> to vector<2x32xf32>
    %106 = vector.shape_cast %105 : vector<2x32xf32> to vector<2x32x1xf32>
    %c0_40 = arith.constant 0 : index
    %c0_41 = arith.constant 0 : index
    %107 = vector.load %arg12[%c0_40, %c0_41] : memref<1x16xf32, #tpu.memory_space<vmem>>, vector<1x16xf32>
    %108 = vector.shape_cast %107 : vector<1x16xf32> to vector<1x1x16xf32>
    %109 = vector.broadcast %108 : vector<1x1x16xf32> to vector<2x1x16xf32>
    %110 = arith.mulf %99, %109 : vector<2x1x16xf32>
    %cst_42 = arith.constant dense<0.000000e+00> : vector<2x1xf32>
    %111 = vector.multi_reduction <add>, %110, %cst_42 [2] : vector<2x1x16xf32> to vector<2x1xf32>
    %112 = vector.shape_cast %111 : vector<2x1xf32> to vector<2x1x1xf32>
    %113 = vector.broadcast %106 : vector<2x32x1xf32> to vector<2x32x256xf32>
    %114 = arith.mulf %74, %113 : vector<2x32x256xf32>
    %cst_43 = arith.constant dense<0.000000e+00> : vector<2x256xf32>
    %115 = vector.multi_reduction <add>, %114, %cst_43 [1] : vector<2x32x256xf32> to vector<2x256xf32>
    %116 = vector.shape_cast %115 : vector<2x256xf32> to vector<2x1x256xf32>
    %117 = vector.broadcast %112 : vector<2x1x1xf32> to vector<2x1x256xf32>
    %118 = arith.addf %116, %117 : vector<2x1x256xf32>
    %119 = arith.negf %118 : vector<2x1x256xf32>
    %120 = math.exp %119 : vector<2x1x256xf32>
    %cst_44 = arith.constant 1.000000e+00 : f32
    %121 = vector.broadcast %cst_44 : f32 to vector<2x1x256xf32>
    %122 = arith.addf %121, %120 : vector<2x1x256xf32>
    %123 = arith.divf %121, %122 : vector<2x1x256xf32>
    %124 = vector.broadcast %123 : vector<2x1x256xf32> to vector<2x32x256xf32>
    %125 = arith.mulf %124, %74 : vector<2x32x256xf32>
    %c0_45 = arith.constant 0 : index
    %c0_46 = arith.constant 0 : index
    %c0_47 = arith.constant 0 : index
    %126 = vector.load %arg13[%c0_45, %c0_46, %c0_47] : memref<2x32x256xf32, #tpu.memory_space<vmem>>, vector<2x32x256xf32>
    tpu.vector_store %arg13[%c0_45, %c0_46, %c0_47], %125 {strides = array<i32>} : memref<2x32x256xf32, #tpu.memory_space<vmem>>, vector<2x32x256xf32>,
    return
  }
  func.func @transform_0(%arg0: i32) -> (i32, i32, i32) {
    %c0_i32 = arith.constant 0 : i32
    %c0_i32_0 = arith.constant 0 : i32
    %c0_i32_1 = arith.constant 0 : i32
    return %arg0, %c0_i32, %c0_i32_0 : i32, i32, i32
  }
  func.func @transform_1(%arg0: i32) -> (i32, i32) {
    %c0_i32 = arith.constant 0 : i32
    %c0_i32_0 = arith.constant 0 : i32
    %c0_i32_1 = arith.constant 0 : i32
    return %c0_i32, %c0_i32_0 : i32, i32
  }
  func.func @transform_2(%arg0: i32) -> (i32, i32) {
    %c0_i32 = arith.constant 0 : i32
    %c0_i32_0 = arith.constant 0 : i32
    %c0_i32_1 = arith.constant 0 : i32
    return %c0_i32, %c0_i32_0 : i32, i32
  }
  func.func @transform_3(%arg0: i32) -> (i32, i32) {
    %c0_i32 = arith.constant 0 : i32
    %c0_i32_0 = arith.constant 0 : i32
    %c0_i32_1 = arith.constant 0 : i32
    return %c0_i32, %c0_i32_0 : i32, i32
  }
  func.func @transform_4(%arg0: i32) -> (i32, i32) {
    %c0_i32 = arith.constant 0 : i32
    %c0_i32_0 = arith.constant 0 : i32
    %c0_i32_1 = arith.constant 0 : i32
    return %c0_i32, %c0_i32_0 : i32, i32
  }
  func.func @transform_5(%arg0: i32) -> (i32, i32) {
    %c0_i32 = arith.constant 0 : i32
    %c0_i32_0 = arith.constant 0 : i32
    %c0_i32_1 = arith.constant 0 : i32
    return %c0_i32, %c0_i32_0 : i32, i32
  }
  func.func @transform_6(%arg0: i32) -> (i32, i32) {
    %c0_i32 = arith.constant 0 : i32
    %c0_i32_0 = arith.constant 0 : i32
    %c0_i32_1 = arith.constant 0 : i32
    return %c0_i32, %c0_i32_0 : i32, i32
  }
  func.func @transform_7(%arg0: i32) -> (i32, i32) {
    %c0_i32 = arith.constant 0 : i32
    %c0_i32_0 = arith.constant 0 : i32
    %c0_i32_1 = arith.constant 0 : i32
    return %c0_i32, %c0_i32_0 : i32, i32
  }
  func.func @transform_8(%arg0: i32) -> (i32, i32) {
    %c0_i32 = arith.constant 0 : i32
    %c0_i32_0 = arith.constant 0 : i32
    %c0_i32_1 = arith.constant 0 : i32
    return %c0_i32, %c0_i32_0 : i32, i32
  }
  func.func @transform_9(%arg0: i32) -> (i32, i32) {
    %c0_i32 = arith.constant 0 : i32
    %c0_i32_0 = arith.constant 0 : i32
    %c0_i32_1 = arith.constant 0 : i32
    return %c0_i32, %c0_i32_0 : i32, i32
  }
  func.func @transform_10(%arg0: i32) -> (i32, i32) {
    %c0_i32 = arith.constant 0 : i32
    %c0_i32_0 = arith.constant 0 : i32
    %c0_i32_1 = arith.constant 0 : i32
    return %c0_i32, %c0_i32_0 : i32, i32
  }
  func.func @transform_11(%arg0: i32) -> (i32, i32) {
    %c0_i32 = arith.constant 0 : i32
    %c0_i32_0 = arith.constant 0 : i32
    %c0_i32_1 = arith.constant 0 : i32
    return %c0_i32, %c0_i32_0 : i32, i32
  }
  func.func @transform_12(%arg0: i32) -> (i32, i32, i32) {
    %c0_i32 = arith.constant 0 : i32
    %c0_i32_0 = arith.constant 0 : i32
    %c0_i32_1 = arith.constant 0 : i32
    return %arg0, %c0_i32, %c0_i32_0 : i32, i32, i32
  }
}

</mosaic_0001>

<bundles_post_ra>
// kernel: tpu_custom_call.1
= control target key start
LH: loop header
LB: loop body
LE: loop exit
PB: predicated region body
PF: predicated region fallthrough
CT: control target
= control target key end

     0   :  { %17 = vsyncpa [#allocation3], 0  ;;  %s1977_s0 = inlined_call_operand.hbm [shape: f32[2,32,256], index: 0, kind: input, shape index: {}]   ;;  %s1978_s1 = inlined_call_operand.hbm [shape: f32[32,1], index: 1, kind: input, shape index: {}]   ;;  %s1979_s2 = inlined_call_operand.hbm [shape: f32[32,16], index: 2, kind: input, shape index: {}]   ;;  %s1980_s3 = inlined_call_operand.hbm [shape: f32[1,16], index: 3, kind: input, shape index: {}]   ;;  %s1981_s4 = inlined_call_operand.hbm [shape: f32[32,16], index: 4, kind: input, shape index: {}]   ;;  %s1982_s5 = inlined_call_operand.hbm [shape: f32[32,1], index: 5, kind: input, shape index: {}]   ;;  %s1983_s6 = inlined_call_operand.hbm [shape: f32[32,1], index: 6, kind: input, shape index: {}]   ;;  %s1984_s7 = inlined_call_operand.hbm [shape: f32[32,1], index: 7, kind: input, shape index: {}]   ;;  %s1985_s8 = inlined_call_operand.hbm [shape: f32[32,16], index: 8, kind: input, shape index: {}]   ;;  %s1986_s9 = inlined_call_operand.hbm [shape: f32[1,16], index: 9, kind: input, shape index: {}]   ;;  %s1987_s10 = inlined_call_operand.hbm [shape: f32[32,16], index: 10, kind: input, shape index: {}]   ;;  %s1988_s11 = inlined_call_operand.hbm [shape: f32[1,16], index: 11, kind: input, shape index: {}]   ;;  %s1989_s12 = inlined_call_operand.hbm [shape: f32[2,32,256], index: 12, kind: output, shape index: {}]  }
   0x1   :  { %18 = vsyncpa [#allocation6], 0 }
   0x2   :  { %19 = vsyncpa [#allocation9], 0 }
   0x3   :  { %20 = vsyncpa [#allocation12], 0 }
   0x4   :  { %21 = vsyncpa [#allocation15], 0 }
   0x5   :  { %22 = vsyncpa [#allocation18], 0 }
   0x6   :  { %23 = vsyncpa [#allocation21], 0 }
   0x7   :  { %24 = vsyncpa [#allocation4], 0  ;;  %s1450_s21 = smov [#allocation5]   ;;  %s1148_s25 = scalar_lea.hbm %s1978_s1, 512 }
   0x8   :  { %s42_s22 = sshll.u32 %s1450_s21, 4  ;;  %p1149_p0 = scmp.ne.s32.totalorder %s1978_s1, %s1148_s25  ;;  %s43_s22 = int_to_ptr.vmem [resolvable:$true] %s42_s22 }
   0x9   :  { %p1152_p1 = scmp.lt.u32.totalorder %s1148_s25, %s1978_s1 }
   0xb   :  { %p1154_p2 = pnand %p1152_p1, %p1149_p0 }
   0xd   :  { %1157 = shalt.err (!%p1154_p2)
}
   0xe   :  { %s1158_s30 = scalar_lea.vmem %s43_s22, 512  ;;  %p1163_p4 = scmp.lt.s32.totalorder %s43_s22, %s43_s22 }
   0xf   :  { %p1159_p3 = scmp.ne.s32.totalorder %s43_s22, %s1158_s30  ;;  %p1164_p5 = scmp.lt.s32.totalorder %s1158_s30, %s1158_s30 }
  0x11   :  { %p1165_p6 = por %p1164_p5, %p1163_p4 }
  0x13   :  { %p1166_p7 = pnand %p1165_p6, %p1159_p3 }
  0x15   :  { %1169 = shalt.err (!%p1166_p7)
}
  0x16   :  { %s1451_s13 = smov 128   ;;  %s1452_s14 = smov 8  }
  0x17   :  { %48 = dma.hbm_to_vmem [thread:$0]  %s1978_s1, 512, %s43_s22, [#allocation6], %s1451_s13, %s1451_s13, %s1452_s14  }
  0x18   :  { %s1453_s17 = smov [#allocation8]   ;;  %s1454_s19 = smov [#allocation11]  }
  0x19   :  { %s67_s18 = sshll.u32 %s1453_s17, 4  ;;  %s88_s20 = sshll.u32 %s1454_s19, 4  ;;  %s68_s18 = int_to_ptr.vmem [resolvable:$true] %s67_s18  ;;  %s89_s20 = int_to_ptr.vmem [resolvable:$true] %s88_s20 }
  0x1a   :  { %s1170_s24 = scalar_lea.hbm %s1980_s3, 16 }
  0x1b   :  { %p1171_p8 = scmp.ne.s32.totalorder %s1980_s3, %s1170_s24  ;;  %p1174_p9 = scmp.lt.u32.totalorder %s1170_s24, %s1980_s3 }
  0x1d   :  { %p1176_p10 = pnand %p1174_p9, %p1171_p8 }
  0x1f   :  { %1179 = shalt.err (!%p1176_p10)
}
  0x20   :  { %s1180_s1 = scalar_lea.vmem %s68_s18, 16  ;;  %s1184_s22 = scalar_lea.vmem %s68_s18, 32 }
  0x21   :  { %p1181_p11 = scmp.ne.s32.totalorder %s68_s18, %s1180_s1  ;;  %p1185_p12 = scmp.lt.s32.totalorder %s68_s18, %s68_s18 }
  0x22   :  { %p1186_p13 = scmp.lt.s32.totalorder %s1184_s22, %s1180_s1 }
  0x24   :  { %p1187_p0 = por %p1186_p13, %p1185_p12 }
  0x26   :  { %p1188_p1 = pnand %p1187_p0, %p1181_p11 }
  0x28   :  { %1191 = shalt.err (!%p1188_p1)
}
  0x29   :  { %70 = dma.hbm_to_vmem [thread:$0]  %s1980_s3, 16, %s68_s18, [#allocation9]  }
  0x2a   :  { %s1192_s17 = scalar_lea.hbm %s1982_s5, 512 }
  0x2b   :  { %p1193_p2 = scmp.ne.s32.totalorder %s1982_s5, %s1192_s17  ;;  %p1196_p3 = scmp.lt.u32.totalorder %s1192_s17, %s1982_s5 }
  0x2d   :  { %p1198_p4 = pnand %p1196_p3, %p1193_p2 }
  0x2f   :  { %1201 = shalt.err (!%p1198_p4)
}
  0x30   :  { %s1202_s25 = scalar_lea.vmem %s89_s20, 512  ;;  %p1207_p6 = scmp.lt.s32.totalorder %s89_s20, %s89_s20 }
  0x31   :  { %p1203_p5 = scmp.ne.s32.totalorder %s89_s20, %s1202_s25  ;;  %p1208_p7 = scmp.lt.s32.totalorder %s1202_s25, %s1202_s25 }
  0x33   :  { %p1209_p8 = por %p1208_p7, %p1207_p6 }
  0x35   :  { %p1210_p9 = pnand %p1209_p8, %p1203_p5 }
  0x37   :  { %1213 = shalt.err (!%p1210_p9)
}
  0x38   :  { %94 = dma.hbm_to_vmem [thread:$0]  %s1982_s5, 512, %s89_s20, [#allocation12], %s1451_s13, %s1451_s13, %s1452_s14  }
  0x39   :  { %s1455_s26 = smov [#allocation14]   ;;  %s1456_s28 = smov [#allocation17]  }
  0x3a   :  { %s112_s27 = sshll.u32 %s1455_s26, 4  ;;  %s137_s1 = sshll.u32 %s1456_s28, 4  ;;  %s113_s27 = int_to_ptr.vmem [resolvable:$true] %s112_s27  ;;  %s138_s1 = int_to_ptr.vmem [resolvable:$true] %s137_s1 }
  0x3b   :  { %s1214_s30 = scalar_lea.hbm %s1984_s7, 512 }
  0x3c   :  { %p1215_p10 = scmp.ne.s32.totalorder %s1984_s7, %s1214_s30  ;;  %p1218_p11 = scmp.lt.u32.totalorder %s1214_s30, %s1984_s7 }
  0x3e   :  { %p1220_p12 = pnand %p1218_p11, %p1215_p10 }
  0x40   :  { %1223 = shalt.err (!%p1220_p12)
}
  0x41   :  { %s1224_s5 = scalar_lea.vmem %s113_s27, 512  ;;  %p1229_p0 = scmp.lt.s32.totalorder %s113_s27, %s113_s27 }
  0x42   :  { %p1225_p13 = scmp.ne.s32.totalorder %s113_s27, %s1224_s5  ;;  %p1230_p1 = scmp.lt.s32.totalorder %s1224_s5, %s1224_s5 }
  0x44   :  { %p1231_p2 = por %p1230_p1, %p1229_p0 }
  0x46   :  { %p1232_p3 = pnand %p1231_p2, %p1225_p13 }
  0x48   :  { %1235 = shalt.err (!%p1232_p3)
}
  0x49   :  { %118 = dma.hbm_to_vmem [thread:$0]  %s1984_s7, 512, %s113_s27, [#allocation15], %s1451_s13, %s1451_s13, %s1452_s14  }
  0x4a   :  { %s1236_s25 = scalar_lea.hbm %s1986_s9, 16 }
  0x4b   :  { %p1237_p4 = scmp.ne.s32.totalorder %s1986_s9, %s1236_s25  ;;  %p1240_p5 = scmp.lt.u32.totalorder %s1236_s25, %s1986_s9 }
  0x4d   :  { %p1242_p6 = pnand %p1240_p5, %p1237_p4 }
  0x4f   :  { %1245 = shalt.err (!%p1242_p6)
}
  0x50   :  { %s1246_s22 = scalar_lea.vmem %s138_s1, 16  ;;  %s1250_s29 = scalar_lea.vmem %s138_s1, 32 }
  0x51   :  { %p1247_p7 = scmp.ne.s32.totalorder %s138_s1, %s1246_s22  ;;  %p1251_p8 = scmp.lt.s32.totalorder %s138_s1, %s138_s1 }
  0x52   :  { %p1252_p9 = scmp.lt.s32.totalorder %s1250_s29, %s1246_s22 }
  0x54   :  { %p1253_p10 = por %p1252_p9, %p1251_p8 }
  0x56   :  { %p1254_p11 = pnand %p1253_p10, %p1247_p7 }
  0x58   :  { %1257 = shalt.err (!%p1254_p11)
}
  0x59   :  { %140 = dma.hbm_to_vmem [thread:$0]  %s1986_s9, 16, %s138_s1, [#allocation18]  }
  0x5a   :  { %s1457_s30 = smov [#allocation2]   ;;  %s1258_s19 = scalar_lea.hbm %s1977_s0, 2048 }
  0x5b   :  { %s30_s15 = sshll.u32 %s1457_s30, 4  ;;  %p1259_p12 = scmp.ne.s32.totalorder %s1977_s0, %s1258_s19  ;;  %s31_s15 = int_to_ptr.vmem [resolvable:$true] %s30_s15 }
  0x5c   :  { %p1262_p13 = scmp.lt.u32.totalorder %s1258_s19, %s1977_s0 }
  0x5e   :  { %p1264_p0 = pnand %p1262_p13, %p1259_p12 }
  0x60   :  { %1267 = shalt.err (!%p1264_p0)
}
  0x61   :  { %s1268_s24 = scalar_lea.vmem %s31_s15, 2048  ;;  %p1273_p2 = scmp.lt.s32.totalorder %s31_s15, %s31_s15 }
  0x62   :  { %p1269_p1 = scmp.ne.s32.totalorder %s31_s15, %s1268_s24  ;;  %p1274_p3 = scmp.lt.s32.totalorder %s1268_s24, %s1268_s24 }
  0x64   :  { %p1275_p4 = por %p1274_p3, %p1273_p2 }
  0x66   :  { %p1276_p5 = pnand %p1275_p4, %p1269_p1 }
  0x68   :  { %1279 = shalt.err (!%p1276_p5)
}
  0x69   :  { %s1458_s9 = smov 256   ;;  %s1459_s1 = smov 16  }
  0x6a   :  { %36 = dma.hbm_to_vmem [thread:$0]  %s1977_s0, 2048, %s31_s15, [#allocation3], %s1458_s9, %s1458_s9, %s1459_s1  }
  0x6b   :  { %s1460_s18 = smov [#allocation7]   ;;  %s1461_s28 = smov [#allocation10]  }
  0x6c   :  { %s54_s26 = sshll.u32 %s1460_s18, 4  ;;  %s76_s22 = sshll.u32 %s1461_s28, 4  ;;  %s55_s26 = int_to_ptr.vmem [resolvable:$true] %s54_s26  ;;  %s1617_s22 = int_to_ptr.vmem [resolvable:$true] %s76_s22 }
  0x6d   :  { %s1280_s27 = scalar_lea.hbm %s1979_s2, 512 }
  0x6e   :  { %p1281_p6 = scmp.ne.s32.totalorder %s1979_s2, %s1280_s27  ;;  %p1284_p7 = scmp.lt.u32.totalorder %s1280_s27, %s1979_s2 }
  0x70   :  { %p1286_p8 = pnand %p1284_p7, %p1281_p6 }
  0x72   :  { %1289 = shalt.err (!%p1286_p8)
}
  0x73   :  { %s1290_s0 = scalar_lea.vmem %s55_s26, 512  ;;  %p1295_p10 = scmp.lt.s32.totalorder %s55_s26, %s55_s26 }
  0x74   :  { %p1291_p9 = scmp.ne.s32.totalorder %s55_s26, %s1290_s0  ;;  %p1296_p11 = scmp.lt.s32.totalorder %s1290_s0, %s1290_s0 }
  0x76   :  { %p1297_p12 = por %p1296_p11, %p1295_p10 }
  0x78   :  { %p1298_p13 = pnand %p1297_p12, %p1291_p9 }
  0x7a   :  { %1301 = shalt.err (!%p1298_p13)
}
  0x7b   :  { %60 = dma.hbm_to_vmem [thread:$0]  %s1979_s2, 512, %s55_s26, [#allocation6], %s1451_s13, %s1451_s13, %s1452_s14  }
  0x7c   :  { %s1302_s23 = scalar_lea.hbm %s1981_s4, 512 }
  0x7d   :  { %p1303_p0 = scmp.ne.s32.totalorder %s1981_s4, %s1302_s23  ;;  %p1306_p1 = scmp.lt.u32.totalorder %s1302_s23, %s1981_s4 }
  0x7f   :  { %p1308_p2 = pnand %p1306_p1, %p1303_p0 }
  0x81   :  { %1311 = shalt.err (!%p1308_p2)
}
  0x82   :  { %s1312_s28 = scalar_lea.vmem %s1617_s22, 512  ;;  %p1317_p4 = scmp.lt.s32.totalorder %s1617_s22, %s1617_s22 }
  0x83   :  { %p1313_p3 = scmp.ne.s32.totalorder %s1617_s22, %s1312_s28  ;;  %p1318_p5 = scmp.lt.s32.totalorder %s1312_s28, %s1312_s28 }
  0x85   :  { %p1319_p6 = por %p1318_p5, %p1317_p4 }
  0x87   :  { %p1320_p7 = pnand %p1319_p6, %p1313_p3 }
  0x89   :  { %1323 = shalt.err (!%p1320_p7)
}
  0x8a   :  { %82 = dma.hbm_to_vmem [thread:$0]  %s1981_s4, 512, %s1617_s22, [#allocation9], %s1451_s13, %s1451_s13, %s1452_s14  }
  0x8b   :  { %s1462_s29 = smov [#allocation13]   ;;  %s1463_s27 = smov [#allocation16]  }
  0x8c   :  { %s100_s7 = sshll.u32 %s1462_s29, 4  ;;  %s124_s30 = sshll.u32 %s1463_s27, 4  ;;  %s101_s7 = int_to_ptr.vmem [resolvable:$true] %s100_s7  ;;  %s1654_s30 = int_to_ptr.vmem [resolvable:$true] %s124_s30 }
  0x8d   :  { %s1324_s19 = scalar_lea.hbm %s1983_s6, 512 }
  0x8e   :  { %p1325_p8 = scmp.ne.s32.totalorder %s1983_s6, %s1324_s19  ;;  %p1328_p9 = scmp.lt.u32.totalorder %s1324_s19, %s1983_s6 }
  0x90   :  { %p1330_p10 = pnand %p1328_p9, %p1325_p8 }
  0x92   :  { %1333 = shalt.err (!%p1330_p10)
}
  0x93   :  { %s1334_s4 = scalar_lea.vmem %s101_s7, 512  ;;  %p1339_p12 = scmp.lt.s32.totalorder %s101_s7, %s101_s7 }
  0x94   :  { %p1335_p11 = scmp.ne.s32.totalorder %s101_s7, %s1334_s4  ;;  %p1340_p13 = scmp.lt.s32.totalorder %s1334_s4, %s1334_s4 }
  0x96   :  { %p1341_p0 = por %p1340_p13, %p1339_p12 }
  0x98   :  { %p1342_p1 = pnand %p1341_p0, %p1335_p11 }
  0x9a   :  { %1345 = shalt.err (!%p1342_p1)
}
  0x9b   :  { %106 = dma.hbm_to_vmem [thread:$0]  %s1983_s6, 512, %s101_s7, [#allocation12], %s1451_s13, %s1451_s13, %s1452_s14  }
  0x9c   :  { %s1346_s25 = scalar_lea.hbm %s1985_s8, 512 }
  0x9d   :  { %p1347_p2 = scmp.ne.s32.totalorder %s1985_s8, %s1346_s25  ;;  %p1350_p3 = scmp.lt.u32.totalorder %s1346_s25, %s1985_s8 }
  0x9f   :  { %p1352_p4 = pnand %p1350_p3, %p1347_p2 }
  0xa1   :  { %1355 = shalt.err (!%p1352_p4)
}
  0xa2   :  { %s1356_s26 = scalar_lea.vmem %s1654_s30, 512  ;;  %p1361_p6 = scmp.lt.s32.totalorder %s1654_s30, %s1654_s30 }
  0xa3   :  { %p1357_p5 = scmp.ne.s32.totalorder %s1654_s30, %s1356_s26  ;;  %p1362_p7 = scmp.lt.s32.totalorder %s1356_s26, %s1356_s26 }
  0xa5   :  { %p1363_p8 = por %p1362_p7, %p1361_p6 }
  0xa7   :  { %p1364_p9 = pnand %p1363_p8, %p1357_p5 }
  0xa9   :  { %1367 = shalt.err (!%p1364_p9)
}
  0xaa   :  { %130 = dma.hbm_to_vmem [thread:$0]  %s1985_s8, 512, %s1654_s30, [#allocation15], %s1451_s13, %s1451_s13, %s1452_s14  }
  0xab   :  { %s1464_s7 = smov [#allocation19]   ;;  %s1465_s16 = smov [#allocation20]  }
  0xac   :  { %s146_s27 = sshll.u32 %s1464_s7, 4  ;;  %s159_s17 = sshll.u32 %s1465_s16, 4  ;;  %s147_s27 = int_to_ptr.vmem [resolvable:$true] %s146_s27  ;;  %s160_s17 = int_to_ptr.vmem [resolvable:$true] %s159_s17 }
  0xad   :  { %s1368_s15 = scalar_lea.hbm %s1987_s10, 512 }
  0xae   :  { %p1369_p10 = scmp.ne.s32.totalorder %s1987_s10, %s1368_s15  ;;  %p1372_p11 = scmp.lt.u32.totalorder %s1368_s15, %s1987_s10 }
  0xb0   :  { %p1374_p12 = pnand %p1372_p11, %p1369_p10 }
  0xb2   :  { %1377 = shalt.err (!%p1374_p12)
}
  0xb3   :  { %s1378_s8 = scalar_lea.vmem %s147_s27, 512  ;;  %p1383_p0 = scmp.lt.s32.totalorder %s147_s27, %s147_s27 }
  0xb4   :  { %p1379_p13 = scmp.ne.s32.totalorder %s147_s27, %s1378_s8  ;;  %p1384_p1 = scmp.lt.s32.totalorder %s1378_s8, %s1378_s8 }
  0xb6   :  { %p1385_p2 = por %p1384_p1, %p1383_p0 }
  0xb8   :  { %p1386_p3 = pnand %p1385_p2, %p1379_p13 }
  0xba   :  { %1389 = shalt.err (!%p1386_p3)
}
  0xbb   :  { %152 = dma.hbm_to_vmem [thread:$0]  %s1987_s10, 512, %s147_s27, [#allocation18], %s1451_s13, %s1451_s13, %s1452_s14  }
  0xbc   :  { %s1390_s25 = scalar_lea.hbm %s1988_s11, 16 }
  0xbd   :  { %p1391_p4 = scmp.ne.s32.totalorder %s1988_s11, %s1390_s25  ;;  %p1394_p5 = scmp.lt.u32.totalorder %s1390_s25, %s1988_s11 }
  0xbf   :  { %p1396_p6 = pnand %p1394_p5, %p1391_p4 }
  0xc1   :  { %1399 = shalt.err (!%p1396_p6)
}
  0xc2   :  { %s1400_s26 = scalar_lea.vmem %s160_s17, 16  ;;  %s1404_s6 = scalar_lea.vmem %s160_s17, 32 }
  0xc3   :  { %p1401_p7 = scmp.ne.s32.totalorder %s160_s17, %s1400_s26  ;;  %p1405_p8 = scmp.lt.s32.totalorder %s160_s17, %s160_s17 }
  0xc4   :  { %p1406_p9 = scmp.lt.s32.totalorder %s1404_s6, %s1400_s26 }
  0xc6   :  { %p1407_p10 = por %p1406_p9, %p1405_p8 }
  0xc8   :  { %p1408_p11 = pnand %p1407_p10, %p1401_p7 }
  0xca   :  { %1411 = shalt.err (!%p1408_p11)
}
  0xcb   :  { %162 = dma.hbm_to_vmem [thread:$0]  %s1988_s11, 16, %s160_s17, [#allocation21]  }
  0xcc   :  { %1434 = dma.done.wait [#allocation3], 2048  }
  0xcd   :  { %1435 = vsyncadd [#allocation3], 4294965248 }
  0xce   :  { %1436 = dma.done.wait [#allocation6], 1024  }
  0xcf   :  { %1437 = vsyncadd [#allocation6], 4294966272 }
  0xd0   :  { %1438 = dma.done.wait [#allocation9], 528  }
  0xd1   :  { %1439 = vsyncadd [#allocation9], 4294966768 }
  0xd2   :  { %1440 = dma.done.wait [#allocation12], 1024  }
  0xd3   :  { %1441 = vsyncadd [#allocation12], 4294966272 }
  0xd4   :  { %1442 = dma.done.wait [#allocation15], 1024  }
  0xd5   :  { %1443 = vsyncadd [#allocation15], 4294966272 }
  0xd6   :  { %1444 = dma.done.wait [#allocation18], 528  }
  0xd7   :  { %1445 = vsyncadd [#allocation18], 4294966768 }
  0xd8   :  { %1446 = dma.done.wait [#allocation21], 16  }
  0xd9   :  { %1447 = vsyncadd [#allocation21], 4294967280  ;;  %v1466_v0 = vmov 0   ;;  %v217_v1 = vld [vmem:[#allocation5 + $0x10] sm:$0xff]  ;;  %v215_v2 = vld [vmem:[#allocation5] sm:$0xff]  ;;  %vm379_vm0 = vcmask 130048  }
  0xda   :  { %1059 = vset.pattern.permute.xlu1 %v1466_v0  ;;  %1058 = vset.pattern.permute.xlu0 %v1466_v0  ;;  %v218_v3 = vld [vmem:[#allocation5 + $0x18] sm:$0xff]  ;;  %v216_v4 = vld [vmem:[#allocation5 + $0x8] sm:$0xff]  ;;  %v1718_v7 = vld [vmem:[#allocation2] sm:$0xff]  ;;  %vm465_vm1 = vcmask 7168   ;;  %vm801_vm2 = vcmask 122880   ;;  %s1467_s11 = smov [#allocation22]  }
  0xdb   :  { %231 = vperm.xlu1 %1059, %v217_v1   ;;  %221 = vperm.xlu0 %1058, %v215_v2   ;;  %v1720_v8 = vld [vmem:[#allocation2 + $0x8] sm:$0xff]  ;;  %v1722_v9 = vld [vmem:[#allocation2 + $0x20] sm:$0xff]  ;;  %v1728_v12 = vld [vmem:[#allocation2 + $0x10] sm:$0xff]  ;;  %s1010_s14 = sshll.u32 %s1467_s11, 4  ;;  %s1011_s14 = int_to_ptr.vmem [resolvable:$true] %s1010_s14 }
  0xdc   :  { %v1724_v10 = vld [vmem:[#allocation2 + $0x40] sm:$0xff]  ;;  %v1726_v11 = vld [vmem:[#allocation2 + $0x48] sm:$0xff]  ;;  %v1730_v13 = vld [vmem:[#allocation2 + $0x18] sm:$0xff]  ;;  %s1412_s29 = scalar_lea.vmem %s1011_s14, 2048  ;;  %p1417_p13 = scmp.lt.s32.totalorder %s1011_s14, %s1011_s14 }
  0xdd   :  { %v1732_v14 = vld [vmem:[#allocation2 + $0x50] sm:$0xff]  ;;  %v1734_v15 = vld [vmem:[#allocation2 + $0x58] sm:$0xff]  ;;  %v1736_v16 = vld [vmem:[#allocation2 + $0x28] sm:$0xff]  ;;  %p1413_p12 = scmp.ne.s32.totalorder %s1011_s14, %s1412_s29  ;;  %p1418_p0 = scmp.lt.s32.totalorder %s1412_s29, %s1412_s29 }
  0xde   :  { %v1738_v17 = vld [vmem:[#allocation2 + $0x60] sm:$0xff]  ;;  %v1740_v18 = vld [vmem:[#allocation2 + $0x68] sm:$0xff]  ;;  %v1746_v24 = vld [vmem:[#allocation2 + $0x30] sm:$0xff] }
  0xdf   :  { %236 = vperm.xlu1 %1059, %v218_v3   ;;  %226 = vperm.xlu0 %1058, %v216_v4   ;;  %v1748_v26 = vld [vmem:[#allocation2 + $0x38] sm:$0xff]  ;;  %v1750_v27 = vld [vmem:[#allocation2 + $0x70] sm:$0xff]  ;;  %p1419_p1 = por %p1418_p0, %p1417_p13 }
  0xe0   :  { %v1752_v28 = vld [vmem:[#allocation2 + $0x78] sm:$0xff] }
  0xe1   :  { %p1420_p2 = pnand %p1419_p1, %p1413_p12 }
 0x15a   :  { %v232_v5 = vpop.permute.xlu1 %231  ;;  %v222_v6 = vpop.permute.xlu0 %221 }
 0x15b   :  { %v239_v20 = vmul.f32 %v222_v6, %v1718_v7  ;;  %v240_v21 = vmul.f32 %v222_v6, %v1720_v8  ;;  %v247_v22 = vmul.f32 %v222_v6, %v1724_v10  ;;  %v248_v23 = vmul.f32 %v222_v6, %v1726_v11 }
 0x15c   :  { %v243_v33 = vmul.f32 %v232_v5, %v1722_v9  ;;  %v244_v34 = vmul.f32 %v232_v5, %v1736_v16  ;;  %v251_v35 = vmul.f32 %v232_v5, %v1738_v17  ;;  %v252_v36 = vmul.f32 %v232_v5, %v1740_v18 }
 0x15e   :  { %v227_v19 = vpop.permute.xlu0 %226  ;;  %v237_v25 = vpop.permute.xlu1 %236 }
 0x15f   :  { %v241_v29 = vmul.f32 %v227_v19, %v1728_v12  ;;  %v242_v30 = vmul.f32 %v227_v19, %v1730_v13  ;;  %v249_v31 = vmul.f32 %v227_v19, %v1732_v14  ;;  %v250_v32 = vmul.f32 %v227_v19, %v1734_v15 }
 0x160   :  { %v245_v41 = vmul.f32 %v237_v25, %v1746_v24  ;;  %v246_v42 = vmul.f32 %v237_v25, %v1748_v26  ;;  %v253_v43 = vmul.f32 %v237_v25, %v1750_v27  ;;  %v254_v44 = vmul.f32 %v237_v25, %v1752_v28 }
 0x161   :  { %v255_v37 = vadd.f32 %v241_v29, %v239_v20  ;;  %v264_v38 = vadd.f32 %v242_v30, %v240_v21  ;;  %v273_v39 = vadd.f32 %v249_v31, %v247_v22  ;;  %v282_v40 = vadd.f32 %v250_v32, %v248_v23 }
 0x163   :  { %v256_v45 = vadd.f32 %v255_v37, %v243_v33  ;;  %v265_v46 = vadd.f32 %v264_v38, %v244_v34  ;;  %v274_v47 = vadd.f32 %v273_v39, %v251_v35  ;;  %v283_v48 = vadd.f32 %v282_v40, %v252_v36 }
 0x165   :  { %v275_v49 = vadd.f32 %v274_v47, %v253_v43  ;;  %v284_v50 = vadd.f32 %v283_v48, %v254_v44  ;;  %v257_v51 = vadd.f32 %v256_v45, %v245_v41  ;;  %v266_v52 = vadd.f32 %v265_v46, %v246_v42 }
 0x167   :  { %v276_v53 = vrot.slane %v275_v49, 4  ;;  %v285_v54 = vrot.slane %v284_v50, 4  ;;  %v258_v55 = vrot.slane %v257_v51, 4  ;;  %v267_v56 = vrot.slane %v266_v52, 4 }
 0x169   :  { %v277_v57 = vadd.f32 %v276_v53, %v275_v49  ;;  %v286_v58 = vadd.f32 %v285_v54, %v284_v50  ;;  %v259_v59 = vadd.f32 %v258_v55, %v257_v51  ;;  %v268_v60 = vadd.f32 %v267_v56, %v266_v52 }
 0x16b   :  { %v278_v61 = vrot.slane %v277_v57, 2  ;;  %v287_v62 = vrot.slane %v286_v58, 2  ;;  %v260_v63 = vrot.slane %v259_v59, 2  ;;  %v269_v0 = vrot.slane %v268_v60, 2 }
 0x16d   :  { %v279_v1 = vadd.f32 %v278_v61, %v277_v57  ;;  %v288_v2 = vadd.f32 %v287_v62, %v286_v58  ;;  %v261_v3 = vadd.f32 %v260_v63, %v259_v59  ;;  %v270_v4 = vadd.f32 %v269_v0, %v268_v60 }
 0x16f   :  { %v280_v5 = vrot.slane %v279_v1, 1  ;;  %v289_v6 = vrot.slane %v288_v2, 1  ;;  %v262_v19 = vrot.slane %v261_v3, 1  ;;  %v271_v20 = vrot.slane %v270_v4, 1 }
 0x171   :  { %v281_v21 = vadd.f32 %v280_v5, %v279_v1  ;;  %v290_v22 = vadd.f32 %v289_v6, %v288_v2  ;;  %v263_v23 = vadd.f32 %v262_v19, %v261_v3  ;;  %v272_v25 = vadd.f32 %v271_v20, %v270_v4 }
 0x173   :  { %v294_v29 = vmax.f32 %v281_v21, %v290_v22  ;;  %v291_v30 = vmax.f32 %v263_v23, %v272_v25 }
 0x175   :  { %295 = vmax.xlane.f32.xlu1 %v294_v29  ;;  %292 = vmax.xlane.f32.xlu0 %v291_v30  ;;  %v367_v30 = vld [vmem:[#allocation7] sm:$0xff] }
 0x202   :  { %v296_v31 = vpop.xlane.xlu1 %295  ;;  %v293_v32 = vpop.xlane.xlu0 %292 }
 0x203   :  { %v299_v33 = vsub.f32 %v281_v21, %v296_v31  ;;  %v300_v34 = vsub.f32 %v290_v22, %v296_v31  ;;  %v297_v35 = vsub.f32 %v263_v23, %v293_v32  ;;  %v298_v36 = vsub.f32 %v272_v25, %v293_v32  ;;  %v368_v31 = vld [vmem:[#allocation7 + $0x8] sm:$0xff]  ;;  %v369_v32 = vld [vmem:[#allocation7 + $0x10] sm:$0xff] }
 0x205   :  { %v305_v37 = vmul.f32 1.442695, %v299_v33  ;;  %v307_v38 = vmul.f32 1.442695, %v300_v34  ;;  %v301_v39 = vmul.f32 1.442695, %v297_v35 }
 0x206   :  { %v303_v40 = vmul.f32 1.442695, %v298_v36 }
 0x207   :  { %1060 = vpow2.f32 %v305_v37 }
 0x208   :  { %1062 = vpow2.f32 %v307_v38 }
 0x209   :  { %1064 = vpow2.f32 %v301_v39 }
 0x20a   :  { %1066 = vpow2.f32 %v303_v40  ;;  %v370_v40 = vld [vmem:[#allocation7 + $0x18] sm:$0xff] }
 0x211   :  { %v1061_v41 = vpop.eup %1060 }
 0x212   :  { %v1063_v42 = vpop.eup %1062  ;;  %v327_v49 = vmul.f32 %v1061_v41, %v1724_v10  ;;  %v329_v58 = vmul.f32 %v1061_v41, %v1732_v14  ;;  %v331_v0 = vmul.f32 %v1061_v41, %v1738_v17  ;;  %v333_v4 = vmul.f32 %v1061_v41, %v1750_v27 }
 0x213   :  { %v1065_v43 = vpop.eup %1064  ;;  %v328_v50 = vmul.f32 %v1063_v42, %v1726_v11  ;;  %v312_v51 = vadd.f32 %v1063_v42, %v1061_v41  ;;  %v330_v59 = vmul.f32 %v1063_v42, %v1734_v15  ;;  %v332_v1 = vmul.f32 %v1063_v42, %v1740_v18 }
 0x214   :  { %v1067_v44 = vpop.eup %1066  ;;  %v319_v45 = vmul.f32 %v1065_v43, %v1718_v7  ;;  %v321_v52 = vmul.f32 %v1065_v43, %v1728_v12  ;;  %v323_v55 = vmul.f32 %v1065_v43, %v1722_v9  ;;  %v325_v61 = vmul.f32 %v1065_v43, %v1746_v24 }
 0x215   :  { %v309_v46 = vadd.f32 %v1067_v44, %v1065_v43  ;;  %v320_v47 = vmul.f32 %v1067_v44, %v1720_v8  ;;  %v322_v53 = vmul.f32 %v1067_v44, %v1730_v13  ;;  %v347_v54 = vadd.f32 %v328_v50, %v327_v49 }
 0x216   :  { %v324_v56 = vmul.f32 %v1067_v44, %v1736_v16  ;;  %v326_v62 = vmul.f32 %v1067_v44, %v1748_v26  ;;  %v350_v63 = vadd.f32 %v330_v59, %v329_v58  ;;  %v353_v3 = vadd.f32 %v332_v1, %v331_v0 }
 0x217   :  { %310 = vadd.xlane.f32.xlu0 %v309_v46  ;;  %v335_v48 = vadd.f32 %v320_v47, %v319_v45  ;;  %v338_v57 = vadd.f32 %v322_v53, %v321_v52  ;;  %v334_v5 = vmul.f32 %v1063_v42, %v1752_v28 }
 0x218   :  { %v341_v60 = vadd.f32 %v324_v56, %v323_v55  ;;  %v344_v2 = vadd.f32 %v326_v62, %v325_v61 }
 0x219   :  { %336 = vadd.xlane.f32.xlu1 %v335_v48  ;;  %v356_v6 = vadd.f32 %v334_v5, %v333_v4 }
 0x21b   :  { %313 = vadd.xlane.f32.xlu0 %v312_v51 }
 0x21d   :  { %348 = vadd.xlane.f32.xlu1 %v347_v54 }
 0x21f   :  { %339 = vadd.xlane.f32.xlu0 %v338_v57 }
 0x221   :  { %342 = vadd.xlane.f32.xlu1 %v341_v60 }
 0x223   :  { %351 = vadd.xlane.f32.xlu0 %v350_v63 }
 0x225   :  { %345 = vadd.xlane.f32.xlu1 %v344_v2 }
 0x227   :  { %354 = vadd.xlane.f32.xlu0 %v353_v3 }
 0x22b   :  { %357 = vadd.xlane.f32.xlu0 %v356_v6  ;;  %v413_v6 = vlaneseq }
 0x2a4   :  { %v311_v19 = vpop.xlane.xlu0 %310 }
 0x2a5   :  { %1068 = vrcp.f32 %v311_v19 }
 0x2a6   :  { %v337_v20 = vpop.xlane.xlu1 %336 }
 0x2a8   :  { %v314_v21 = vpop.xlane.xlu0 %313 }
 0x2a9   :  { %1070 = vrcp.f32 %v314_v21 }
 0x2aa   :  { %v349_v22 = vpop.xlane.xlu1 %348 }
 0x2ac   :  { %v340_v23 = vpop.xlane.xlu0 %339 }
 0x2ae   :  { %v343_v25 = vpop.xlane.xlu1 %342 }
 0x2af   :  { %v1069_v29 = vpop.eup %1068 }
 0x2b0   :  { %v359_v33 = vmul.f32 %v1069_v29, %v337_v20  ;;  %v360_v34 = vmul.f32 %v1069_v29, %v340_v23  ;;  %v361_v35 = vmul.f32 %v1069_v29, %v343_v25  ;;  %v352_v36 = vpop.xlane.xlu0 %351  ;;  %v414_v23 = vshrl.u32 %v413_v6, 7 }
 0x2b2   :  { %v371_v37 = vmul.f32 %v367_v30, %v359_v33  ;;  %v372_v38 = vmul.f32 %v368_v31, %v360_v34  ;;  %v373_v39 = vmul.f32 %v369_v32, %v361_v35  ;;  %v346_v41 = vpop.xlane.xlu1 %345  ;;  %v1790_v33 = vsub.s32 0, %v414_v23 }
 0x2b3   :  { %v1071_v42 = vpop.eup %1070  ;;  %v362_v43 = vmul.f32 %v1069_v29, %v346_v41 }
 0x2b4   :  { %v380_v44 = vsel %vm379_vm0, %v371_v37, 0.0  ;;  %v363_v45 = vmul.f32 %v1071_v42, %v349_v22  ;;  %v381_v46 = vsel %vm379_vm0, %v372_v38, 0.0  ;;  %v355_v47 = vpop.xlane.xlu0 %354  ;;  %v364_v49 = vmul.f32 %v1071_v42, %v352_v36  ;;  %v410_v37 = vld [vmem:[#allocation10 + $0x8] sm:$0xff]  ;;  %v409_v38 = vld [vmem:[#allocation10] sm:$0xff] }
 0x2b5   :  { %v382_v48 = vadd.f32 %v381_v46, %v380_v44  ;;  %v374_v50 = vmul.f32 %v370_v40, %v362_v43  ;;  %v365_v51 = vmul.f32 %v1071_v42, %v355_v47  ;;  %v383_v53 = vsel %vm379_vm0, %v373_v39, 0.0  ;;  %v411_v47 = vld [vmem:[#allocation10 + $0x10] sm:$0xff] }
 0x2b6   :  { %v375_v52 = vmul.f32 %v367_v30, %v363_v45  ;;  %v376_v55 = vmul.f32 %v368_v31, %v364_v49  ;;  %v406_v31 = vld [vmem:[#allocation8] sm:$0x1] }
 0x2b7   :  { %v384_v54 = vadd.f32 %v383_v53, %v382_v48  ;;  %v385_v56 = vsel %vm379_vm0, %v374_v50, 0.0  ;;  %v377_v57 = vmul.f32 %v369_v32, %v365_v51 }
 0x2b8   :  { %v393_v58 = vsel %vm379_vm0, %v375_v52, 0.0  ;;  %v358_v59 = vpop.xlane.xlu0 %357  ;;  %v394_v60 = vsel %vm379_vm0, %v376_v55, 0.0 }
 0x2b9   :  { %v386_v61 = vadd.f32 %v385_v56, %v384_v54  ;;  %v396_v62 = vsel %vm379_vm0, %v377_v57, 0.0  ;;  %v366_v63 = vmul.f32 %v1071_v42, %v358_v59  ;;  %v395_v0 = vadd.f32 %v394_v60, %v393_v58  ;;  %v412_v54 = vld [vmem:[#allocation10 + $0x18] sm:$0xff] }
 0x2bb   :  { %v387_v1 = vrot.slane %v386_v61, 4  ;;  %v378_v2 = vmul.f32 %v370_v40, %v366_v63  ;;  %v397_v3 = vadd.f32 %v396_v62, %v395_v0  ;;  %v679_v62 = vadd.f32 %v1720_v8, %v1718_v7 }
 0x2bc   :  { %v694_v63 = vadd.f32 %v1734_v15, %v1732_v14  ;;  %v691_v0 = vadd.f32 %v1726_v11, %v1724_v10  ;;  %v700_v7 = vadd.f32 %v1752_v28, %v1750_v27  ;;  %v688_v8 = vadd.f32 %v1748_v26, %v1746_v24  ;;  %v453_v11 = vld [vmem:[#allocation11] sm:$0xff] }
 0x2bd   :  { %v388_v4 = vadd.f32 %v387_v1, %v386_v61  ;;  %v398_v5 = vsel %vm379_vm0, %v378_v2, 0.0  ;;  %v682_v61 = vadd.f32 %v1730_v13, %v1728_v12  ;;  %v697_v1 = vadd.f32 %v1740_v18, %v1738_v17  ;;  %v454_v13 = vld [vmem:[#allocation11 + $0x8] sm:$0xff] }
 0x2be   :  { %v399_v19 = vadd.f32 %v398_v5, %v397_v3  ;;  %v685_v2 = vadd.f32 %v1736_v16, %v1722_v9  ;;  %v455_v3 = vld [vmem:[#allocation11 + $0x10] sm:$0xff] }
 0x2bf   :  { %v389_v20 = vrot.slane %v388_v4, 2 }
 0x2c0   :  { %v400_v21 = vrot.slane %v399_v19, 4 }
 0x2c1   :  { %v390_v22 = vadd.f32 %v389_v20, %v388_v4  ;;  %v456_v20 = vld [vmem:[#allocation11 + $0x18] sm:$0xff] }
 0x2c2   :  { %v401_v25 = vadd.f32 %v400_v21, %v399_v19 }
 0x2c3   :  { %v391_v29 = vrot.slane %v390_v22, 1 }
 0x2c4   :  { %v402_v30 = vrot.slane %v401_v25, 2 }
 0x2c5   :  { %v392_v32 = vadd.f32 %v391_v29, %v390_v22 }
 0x2c6   :  { %v403_v34 = vadd.f32 %v402_v30, %v401_v25 }
 0x2c7   :  { %v407_v35 = vadd.f32 %v406_v31, %v392_v32 }
 0x2c8   :  { %v404_v36 = vrot.slane %v403_v34, 1 }
 0x2c9   :  { %v416_v39 = vrot.slane %v407_v35, %v1790_v33 }
 0x2ca   :  { %v405_v40 = vadd.f32 %v404_v36, %v403_v34 }
 0x2cb   :  { %v422_v41 = vmul.f32 %v416_v39, %v410_v37  ;;  %v421_v42 = vmul.f32 %v416_v39, %v409_v38  ;;  %v423_v53 = vmul.f32 %v416_v39, %v411_v47  ;;  %v424_v58 = vmul.f32 %v416_v39, %v412_v54 }
 0x2cc   :  { %v408_v43 = vadd.f32 %v406_v31, %v405_v40 }
 0x2cd   :  { %v432_v44 = vsel %vm379_vm0, %v422_v41, 0.0  ;;  %v429_v45 = vsel %vm379_vm0, %v421_v42, 0.0  ;;  %v435_v56 = vsel %vm379_vm0, %v423_v53, 0.0  ;;  %v438_v60 = vsel %vm379_vm0, %v424_v58, 0.0 }
 0x2ce   :  { %433 = vadd.xlane.f32.xlu0 %v432_v44  ;;  %430 = vadd.xlane.f32.xlu1 %v429_v45  ;;  %v420_v46 = vrot.slane %v408_v43, %v1790_v33 }
 0x2d0   :  { %v426_v48 = vmul.f32 %v420_v46, %v410_v37  ;;  %v425_v49 = vmul.f32 %v420_v46, %v409_v38  ;;  %v427_v52 = vmul.f32 %v420_v46, %v411_v47  ;;  %v428_v57 = vmul.f32 %v420_v46, %v412_v54 }
 0x2d2   :  { %v444_v50 = vsel %vm379_vm0, %v426_v48, 0.0  ;;  %v441_v51 = vsel %vm379_vm0, %v425_v49, 0.0  ;;  %v447_v55 = vsel %vm379_vm0, %v427_v52, 0.0  ;;  %v450_v59 = vsel %vm379_vm0, %v428_v57, 0.0 }
 0x2d3   :  { %445 = vadd.xlane.f32.xlu0 %v444_v50  ;;  %442 = vadd.xlane.f32.xlu1 %v441_v51 }
 0x2d7   :  { %448 = vadd.xlane.f32.xlu0 %v447_v55  ;;  %436 = vadd.xlane.f32.xlu1 %v435_v56 }
 0x2db   :  { %451 = vadd.xlane.f32.xlu0 %v450_v59  ;;  %439 = vadd.xlane.f32.xlu1 %v438_v60 }
 0x2df   :  { %683 = vadd.xlane.f32.xlu0 %v682_v61  ;;  %680 = vadd.xlane.f32.xlu1 %v679_v62 }
 0x2e3   :  { %695 = vadd.xlane.f32.xlu0 %v694_v63  ;;  %692 = vadd.xlane.f32.xlu1 %v691_v0 }
 0x2e7   :  { %698 = vadd.xlane.f32.xlu0 %v697_v1  ;;  %686 = vadd.xlane.f32.xlu1 %v685_v2 }
 0x2eb   :  { %701 = vadd.xlane.f32.xlu0 %v700_v7  ;;  %689 = vadd.xlane.f32.xlu1 %v688_v8 }
 0x35b   :  { %v431_v12 = vpop.xlane.xlu1 %430  ;;  %v434_v10 = vpop.xlane.xlu0 %433 }
 0x35c   :  { %v457_v14 = vadd.f32 %v453_v11, %v431_v12  ;;  %v458_v15 = vadd.f32 %v454_v13, %v434_v10 }
 0x35e   :  { %v466_v4 = vsel %vm465_vm1, %v457_v14, 0.0  ;;  %v467_v27 = vsel %vm465_vm1, %v458_v15, 0.0 }
 0x35f   :  { %v468_v23 = vadd.f32 %v467_v27, %v466_v4 }
 0x360   :  { %v443_v17 = vpop.xlane.xlu1 %442  ;;  %v446_v18 = vpop.xlane.xlu0 %445 }
 0x361   :  { %v461_v9 = vadd.f32 %v453_v11, %v443_v17  ;;  %v462_v16 = vadd.f32 %v454_v13, %v446_v18 }
 0x363   :  { %v479_v26 = vsel %vm465_vm1, %v461_v9, 0.0  ;;  %v480_v5 = vsel %vm465_vm1, %v462_v16, 0.0 }
 0x364   :  { %v437_v28 = vpop.xlane.xlu1 %436  ;;  %v449_v24 = vpop.xlane.xlu0 %448  ;;  %v481_v25 = vadd.f32 %v480_v5, %v479_v26 }
 0x365   :  { %v459_v6 = vadd.f32 %v455_v3, %v437_v28  ;;  %v463_v19 = vadd.f32 %v455_v3, %v449_v24 }
 0x367   :  { %v469_v21 = vsel %vm465_vm1, %v459_v6, 0.0  ;;  %v482_v22 = vsel %vm465_vm1, %v463_v19, 0.0 }
 0x368   :  { %v440_v29 = vpop.xlane.xlu1 %439  ;;  %v452_v30 = vpop.xlane.xlu0 %451  ;;  %v470_v34 = vadd.f32 %v469_v21, %v468_v23  ;;  %v483_v35 = vadd.f32 %v482_v22, %v481_v25 }
 0x369   :  { %v460_v31 = vadd.f32 %v456_v20, %v440_v29  ;;  %v464_v32 = vadd.f32 %v456_v20, %v452_v30 }
 0x36b   :  { %v471_v36 = vsel %vm465_vm1, %v460_v31, 0.0  ;;  %v484_v37 = vsel %vm465_vm1, %v464_v32, 0.0 }
 0x36c   :  { %v472_v38 = vadd.f32 %v471_v36, %v470_v34  ;;  %v485_v39 = vadd.f32 %v484_v37, %v483_v35  ;;  %v553_v37 = vld [vmem:[#allocation13 + $0x10] sm:$0xff] }
 0x36e   :  { %v473_v40 = vrot.slane %v472_v38, 4  ;;  %v486_v41 = vrot.slane %v485_v39, 4 }
 0x370   :  { %v474_v42 = vadd.f32 %v473_v40, %v472_v38  ;;  %v487_v43 = vadd.f32 %v486_v41, %v485_v39  ;;  %v554_v39 = vld [vmem:[#allocation13 + $0x18] sm:$0xff]  ;;  %v551_v40 = vld [vmem:[#allocation13] sm:$0xff]  ;;  %v552_v41 = vld [vmem:[#allocation13 + $0x8] sm:$0xff] }
 0x372   :  { %v475_v44 = vrot.slane %v474_v42, 2  ;;  %v488_v45 = vrot.slane %v487_v43, 2 }
 0x374   :  { %v476_v46 = vadd.f32 %v475_v44, %v474_v42  ;;  %v489_v47 = vadd.f32 %v488_v45, %v487_v43 }
 0x376   :  { %v477_v48 = vrot.slane %v476_v46, 1  ;;  %v490_v49 = vrot.slane %v489_v47, 1 }
 0x378   :  { %v478_v50 = vadd.f32 %v477_v48, %v476_v46  ;;  %v491_v51 = vadd.f32 %v490_v49, %v489_v47  ;;  %v566_v47 = vld [vmem:[#allocation14 + $0x18] sm:$0xff] }
 0x37a   :  { %v493_v52 = vmul.f32 0.03125, %v478_v50  ;;  %v494_v53 = vmul.f32 0.03125, %v491_v51  ;;  %v563_v51 = vld [vmem:[#allocation14] sm:$0xff] }
 0x37c   :  { %v495_v54 = vsub.f32 %v457_v14, %v493_v52  ;;  %v496_v55 = vsub.f32 %v458_v15, %v493_v52  ;;  %v497_v56 = vsub.f32 %v459_v6, %v493_v52  ;;  %v498_v57 = vsub.f32 %v460_v31, %v493_v52  ;;  %v564_v52 = vld [vmem:[#allocation14 + $0x8] sm:$0xff] }
 0x37d   :  { %v499_v58 = vsub.f32 %v461_v9, %v494_v53  ;;  %v500_v59 = vsub.f32 %v462_v16, %v494_v53  ;;  %v501_v60 = vsub.f32 %v463_v19, %v494_v53  ;;  %v502_v61 = vsub.f32 %v464_v32, %v494_v53 }
 0x37e   :  { %v503_v62 = vmul.f32 %v495_v54, %v495_v54  ;;  %v504_v63 = vmul.f32 %v496_v55, %v496_v55  ;;  %v505_v0 = vmul.f32 %v497_v56, %v497_v56  ;;  %v506_v8 = vmul.f32 %v498_v57, %v498_v57 }
 0x37f   :  { %v507_v1 = vmul.f32 %v499_v58, %v499_v58  ;;  %v508_v2 = vmul.f32 %v500_v59, %v500_v59  ;;  %v509_v7 = vmul.f32 %v501_v60, %v501_v60  ;;  %v510_v13 = vmul.f32 %v502_v61, %v502_v61 }
 0x380   :  { %v511_v12 = vsel %vm465_vm1, %v503_v62, 0.0  ;;  %v512_v10 = vsel %vm465_vm1, %v504_v63, 0.0  ;;  %v514_v17 = vsel %vm465_vm1, %v505_v0, 0.0  ;;  %v516_v3 = vsel %vm465_vm1, %v506_v8, 0.0  ;;  %v565_v8 = vld [vmem:[#allocation14 + $0x10] sm:$0xff] }
 0x381   :  { %v513_v11 = vadd.f32 %v512_v10, %v511_v12  ;;  %v524_v14 = vsel %vm465_vm1, %v507_v1, 0.0  ;;  %v525_v15 = vsel %vm465_vm1, %v508_v2, 0.0  ;;  %v527_v16 = vsel %vm465_vm1, %v509_v7, 0.0 }
 0x382   :  { %v526_v18 = vadd.f32 %v525_v15, %v524_v14  ;;  %v529_v28 = vsel %vm465_vm1, %v510_v13, 0.0 }
 0x383   :  { %v515_v9 = vadd.f32 %v514_v17, %v513_v11 }
 0x384   :  { %v528_v4 = vadd.f32 %v527_v16, %v526_v18 }
 0x385   :  { %v517_v27 = vadd.f32 %v516_v3, %v515_v9  ;;  %v681_v3 = vpop.xlane.xlu1 %680 }
 0x386   :  { %v530_v24 = vadd.f32 %v529_v28, %v528_v4 }
 0x387   :  { %v518_v26 = vrot.slane %v517_v27, 4 }
 0x388   :  { %v531_v5 = vrot.slane %v530_v24, 4 }
 0x389   :  { %v519_v6 = vadd.f32 %v518_v26, %v517_v27 }
 0x38a   :  { %v532_v19 = vadd.f32 %v531_v5, %v530_v24 }
 0x38b   :  { %v520_v20 = vrot.slane %v519_v6, 2 }
 0x38c   :  { %v533_v21 = vrot.slane %v532_v19, 2 }
 0x38d   :  { %v521_v22 = vadd.f32 %v520_v20, %v519_v6 }
 0x38e   :  { %v534_v23 = vadd.f32 %v533_v21, %v532_v19  ;;  %v693_v21 = vpop.xlane.xlu1 %692 }
 0x38f   :  { %v522_v25 = vrot.slane %v521_v22, 1 }
 0x390   :  { %v535_v29 = vrot.slane %v534_v23, 1 }
 0x391   :  { %v523_v30 = vadd.f32 %v522_v25, %v521_v22  ;;  %v684_v22 = vpop.xlane.xlu0 %683 }
 0x392   :  { %v536_v31 = vadd.f32 %v535_v29, %v534_v23 }
 0x393   :  { %v537_v32 = vmul.f32 0.03125, %v523_v30 }
 0x394   :  { %v538_v34 = vmul.f32 0.03125, %v536_v31 }
 0x395   :  { %v539_v35 = vadd.f32 1e-05, %v537_v32 }
 0x396   :  { %v540_v36 = vadd.f32 1e-05, %v538_v34  ;;  %v704_v34 = vmul.f32 0.00390625, %v681_v3 }
 0x397   :  { %1072 = vrsqrt.f32 %v539_v35  ;;  %v687_v35 = vpop.xlane.xlu1 %686 }
 0x398   :  { %1074 = vrsqrt.f32 %v540_v36  ;;  %v705_v36 = vmul.f32 0.00390625, %v684_v22 }
 0x3a1   :  { %v1073_v38 = vpop.eup %1072 }
 0x3a2   :  { %v1075_v42 = vpop.eup %1074  ;;  %v543_v43 = vmul.f32 %v1073_v38, %v495_v54  ;;  %v544_v44 = vmul.f32 %v1073_v38, %v496_v55  ;;  %v545_v45 = vmul.f32 %v1073_v38, %v497_v56  ;;  %v546_v46 = vmul.f32 %v1073_v38, %v498_v57 }
 0x3a3   :  { %v547_v48 = vmul.f32 %v1075_v42, %v499_v58  ;;  %v548_v49 = vmul.f32 %v1075_v42, %v500_v59  ;;  %v549_v50 = vmul.f32 %v1075_v42, %v501_v60  ;;  %v550_v1 = vmul.f32 %v1075_v42, %v502_v61 }
 0x3a4   :  { %v557_v53 = vmul.f32 %v553_v37, %v545_v45  ;;  %v558_v62 = vmul.f32 %v554_v39, %v546_v46  ;;  %v555_v63 = vmul.f32 %v551_v40, %v543_v43  ;;  %v556_v0 = vmul.f32 %v552_v41, %v544_v44  ;;  %v690_v46 = vpop.xlane.xlu1 %689 }
 0x3a5   :  { %v559_v2 = vmul.f32 %v551_v40, %v547_v48  ;;  %v560_v7 = vmul.f32 %v552_v41, %v548_v49  ;;  %v561_v10 = vmul.f32 %v553_v37, %v549_v50  ;;  %v562_v13 = vmul.f32 %v554_v39, %v550_v1  ;;  %v696_v37 = vpop.xlane.xlu0 %695 }
 0x3a6   :  { %v570_v12 = vadd.f32 %v566_v47, %v558_v62  ;;  %v567_v54 = vadd.f32 %v563_v51, %v555_v63  ;;  %v568_v55 = vadd.f32 %v564_v52, %v556_v0  ;;  %v569_v59 = vadd.f32 %v565_v8, %v557_v53 }
 0x3a7   :  { %v571_v56 = vadd.f32 %v563_v51, %v559_v2  ;;  %v572_v57 = vadd.f32 %v564_v52, %v560_v7  ;;  %v573_v15 = vadd.f32 %v565_v8, %v561_v10  ;;  %v574_v18 = vadd.f32 %v566_v47, %v562_v13 }
 0x3a8   :  { %v1031_v11 = vmul.f32 -1.442695, %v570_v12  ;;  %v1028_v58 = vmul.f32 -1.442695, %v567_v54  ;;  %v1029_v60 = vmul.f32 -1.442695, %v568_v55 }
 0x3a9   :  { %v1032_v14 = vmul.f32 -1.442695, %v571_v56  ;;  %v1033_v17 = vmul.f32 -1.442695, %v572_v57  ;;  %v1030_v61 = vmul.f32 -1.442695, %v569_v59  ;;  %v699_v48 = vpop.xlane.xlu0 %698 }
 0x3aa   :  { %1076 = vpow2.f32 %v1031_v11  ;;  %v1034_v9 = vmul.f32 -1.442695, %v573_v15  ;;  %v1035_v16 = vmul.f32 -1.442695, %v574_v18  ;;  %v708_v42 = vmul.f32 0.00390625, %v693_v21  ;;  %v720_v55 = vld [vmem:[#allocation16] sm:$0xff] }
 0x3ab   :  { %1078 = vpow2.f32 %v1028_v58  ;;  %v706_v45 = vmul.f32 0.00390625, %v687_v35  ;;  %v709_v50 = vmul.f32 0.00390625, %v696_v37  ;;  %v707_v53 = vmul.f32 0.00390625, %v690_v46  ;;  %v721_v56 = vld [vmem:[#allocation16 + $0x8] sm:$0xff]  ;;  %v723_v18 = vld [vmem:[#allocation16 + $0x18] sm:$0xff] }
 0x3ac   :  { %1080 = vpow2.f32 %v1029_v60  ;;  %v710_v0 = vmul.f32 0.00390625, %v699_v48  ;;  %v722_v60 = vld [vmem:[#allocation16 + $0x10] sm:$0xff] }
 0x3ad   :  { %1082 = vpow2.f32 %v1032_v14  ;;  %v702_v7 = vpop.xlane.xlu0 %701 }
 0x3ae   :  { %1084 = vpow2.f32 %v1033_v17  ;;  %v711_v12 = vmul.f32 0.00390625, %v702_v7 }
 0x3af   :  { %1086 = vpow2.f32 %v1030_v61 }
 0x3b0   :  { %1088 = vpow2.f32 %v1034_v9 }
 0x3b1   :  { %1090 = vpow2.f32 %v1035_v16 }
 0x3b4   :  { %v1077_v4 = vpop.eup %1076 }
 0x3b5   :  { %v1079_v27 = vpop.eup %1078  ;;  %v602_v30 = vadd.f32 1.0, %v1077_v4 }
 0x3b6   :  { %v1081_v28 = vpop.eup %1080  ;;  %v599_v24 = vadd.f32 1.0, %v1079_v27 }
 0x3b7   :  { %v1083_v26 = vpop.eup %1082  ;;  %v600_v5 = vadd.f32 1.0, %v1081_v28 }
 0x3b8   :  { %v1085_v6 = vpop.eup %1084  ;;  %1092 = vrcp.f32 %v599_v24  ;;  %v603_v19 = vadd.f32 1.0, %v1083_v26 }
 0x3b9   :  { %v1087_v20 = vpop.eup %1086  ;;  %1094 = vrcp.f32 %v600_v5  ;;  %v604_v23 = vadd.f32 1.0, %v1085_v6 }
 0x3ba   :  { %1096 = vrcp.f32 %v603_v19  ;;  %v601_v25 = vadd.f32 1.0, %v1087_v20  ;;  %v1089_v29 = vpop.eup %1088 }
 0x3bb   :  { %v605_v31 = vadd.f32 1.0, %v1089_v29  ;;  %v1091_v32 = vpop.eup %1090 }
 0x3bc   :  { %1098 = vrcp.f32 %v601_v25  ;;  %v606_v39 = vadd.f32 1.0, %v1091_v32 }
 0x3bd   :  { %1100 = vrcp.f32 %v604_v23 }
 0x3be   :  { %1102 = vrcp.f32 %v602_v30 }
 0x3bf   :  { %1104 = vrcp.f32 %v605_v31 }
 0x3c0   :  { %1106 = vrcp.f32 %v606_v39 }
 0x3c2   :  { %v1834_v38 = vpop.eup %1092 }
 0x3c3   :  { %v1836_v40 = vpop.eup %1094  ;;  %v712_v41 = vmul.f32 %v1834_v38, %v704_v34 }
 0x3c4   :  { %v1839_v43 = vpop.eup %1096  ;;  %v713_v44 = vmul.f32 %v1836_v40, %v705_v36 }
 0x3c5   :  { %726 = vperm.xlu1 %1059, %v712_v41   ;;  %v716_v49 = vmul.f32 %v1839_v43, %v708_v42 }
 0x3c6   :  { %v1842_v47 = vpop.eup %1098  ;;  %731 = vperm.xlu0 %1058, %v713_v44  }
 0x3c7   :  { %v1845_v51 = vpop.eup %1100  ;;  %v714_v52 = vmul.f32 %v1842_v47, %v706_v45  ;;  %v798_v45 = vld [vmem:[#allocation17] sm:$0x1] }
 0x3c8   :  { %v1848_v62 = vpop.eup %1102  ;;  %v717_v63 = vmul.f32 %v1845_v51, %v709_v50 }
 0x3c9   :  { %746 = vperm.xlu1 %1059, %v716_v49   ;;  %v1851_v1 = vpop.eup %1104  ;;  %v715_v2 = vmul.f32 %v1848_v62, %v707_v53 }
 0x3ca   :  { %736 = vperm.xlu0 %1058, %v714_v52   ;;  %v718_v8 = vmul.f32 %v1851_v1, %v710_v0  ;;  %v1855_v10 = vpop.eup %1106 }
 0x3cb   :  { %v719_v54 = vmul.f32 %v1855_v10, %v711_v12 }
 0x3cd   :  { %751 = vperm.xlu1 %1059, %v717_v63  }
 0x3ce   :  { %741 = vperm.xlu0 %1058, %v715_v2  }
 0x3d1   :  { %756 = vperm.xlu1 %1059, %v718_v8  }
 0x3d5   :  { %761 = vperm.xlu1 %1059, %v719_v54  }
 0x444   :  { %v727_v57 = vpop.permute.xlu1 %726 }
 0x445   :  { %v732_v11 = vpop.permute.xlu0 %731  ;;  %v764_v58 = vmul.f32 %v727_v57, %v720_v55 }
 0x446   :  { %v765_v59 = vmul.f32 %v732_v11, %v721_v56 }
 0x447   :  { %v772_v15 = vsel %vm379_vm0, %v764_v58, 0.0 }
 0x448   :  { %v747_v13 = vpop.permute.xlu1 %746  ;;  %v773_v17 = vsel %vm379_vm0, %v765_v59, 0.0 }
 0x449   :  { %v737_v14 = vpop.permute.xlu0 %736  ;;  %v774_v3 = vadd.f32 %v773_v17, %v772_v15  ;;  %v768_v24 = vmul.f32 %v747_v13, %v720_v55  ;;  %v824_v13 = vld [vmem:[#allocation19] sm:$0xff] }
 0x44a   :  { %v766_v61 = vmul.f32 %v737_v14, %v722_v60 }
 0x44b   :  { %v785_v22 = vsel %vm379_vm0, %v768_v24, 0.0 }
 0x44c   :  { %v775_v9 = vsel %vm379_vm0, %v766_v61, 0.0  ;;  %v752_v16 = vpop.permute.xlu1 %751 }
 0x44d   :  { %v769_v4 = vmul.f32 %v752_v16, %v721_v56  ;;  %v742_v27 = vpop.permute.xlu0 %741  ;;  %v776_v26 = vadd.f32 %v775_v9, %v774_v3  ;;  %v826_v3 = vld [vmem:[#allocation19 + $0x10] sm:$0xff] }
 0x44e   :  { %v767_v28 = vmul.f32 %v742_v27, %v723_v18 }
 0x44f   :  { %v786_v19 = vsel %vm379_vm0, %v769_v4, 0.0 }
 0x450   :  { %v777_v5 = vsel %vm379_vm0, %v767_v28, 0.0  ;;  %v757_v6 = vpop.permute.xlu1 %756  ;;  %v787_v29 = vadd.f32 %v786_v19, %v785_v22 }
 0x451   :  { %v778_v20 = vadd.f32 %v777_v5, %v776_v26  ;;  %v770_v21 = vmul.f32 %v757_v6, %v722_v60  ;;  %v825_v60 = vld [vmem:[#allocation19 + $0x8] sm:$0xff]  ;;  %v827_v6 = vld [vmem:[#allocation19 + $0x18] sm:$0xff] }
 0x453   :  { %v779_v23 = vrot.slane %v778_v20, 4  ;;  %v788_v25 = vsel %vm379_vm0, %v770_v21, 0.0 }
 0x454   :  { %v762_v30 = vpop.permute.xlu1 %761  ;;  %v789_v34 = vadd.f32 %v788_v25, %v787_v29  ;;  %v868_v29 = vld [vmem:[#allocation20] sm:$0x1] }
 0x455   :  { %v780_v31 = vadd.f32 %v779_v23, %v778_v20  ;;  %v771_v32 = vmul.f32 %v762_v30, %v723_v18 }
 0x457   :  { %v781_v35 = vrot.slane %v780_v31, 2  ;;  %v790_v36 = vsel %vm379_vm0, %v771_v32, 0.0 }
 0x458   :  { %v791_v37 = vadd.f32 %v790_v36, %v789_v34 }
 0x459   :  { %v782_v39 = vadd.f32 %v781_v35, %v780_v31 }
 0x45a   :  { %v792_v41 = vrot.slane %v791_v37, 4 }
 0x45b   :  { %v783_v42 = vrot.slane %v782_v39, 1 }
 0x45c   :  { %v793_v44 = vadd.f32 %v792_v41, %v791_v37 }
 0x45d   :  { %v784_v46 = vadd.f32 %v783_v42, %v782_v39 }
 0x45e   :  { %v794_v48 = vrot.slane %v793_v44, 2 }
 0x45f   :  { %v799_v49 = vadd.f32 %v798_v45, %v784_v46 }
 0x460   :  { %v795_v50 = vadd.f32 %v794_v48, %v793_v44 }
 0x461   :  { %v802_v52 = vsel %vm801_vm2, %v799_v49, -inf }
 0x462   :  { %803 = vmax.xlane.f32.xlu0 %v802_v52  ;;  %v796_v53 = vrot.slane %v795_v50, 1 }
 0x464   :  { %v797_v63 = vadd.f32 %v796_v53, %v795_v50  ;;  %v1132_v50 = vld [vmem:[#allocation2 + $0x10] sm:$0xff]  ;;  %v1133_v53 = vld [vmem:[#allocation2 + $0x18] sm:$0xff] }
 0x466   :  { %v800_v0 = vadd.f32 %v798_v45, %v797_v63 }
 0x468   :  { %v805_v2 = vsel %vm801_vm2, %v800_v0, -inf }
 0x469   :  { %806 = vmax.xlane.f32.xlu1 %v805_v2 }
 0x478   :  { %630 = vperm.xlu0 %1058, %v1836_v40  }
 0x47a   :  { %625 = vperm.xlu1 %1059, %v1834_v38  }
 0x47e   :  { %645 = vperm.xlu1 %1059, %v1839_v43  }
 0x482   :  { %650 = vperm.xlu1 %1059, %v1845_v51  }
 0x486   :  { %655 = vperm.xlu1 %1059, %v1851_v1  }
 0x4ef   :  { %v804_v7 = vpop.xlane.xlu0 %803 }
 0x4f0   :  { %v808_v8 = vsub.f32 %v799_v49, %v804_v7  ;;  %v1135_v7 = vld [vmem:[#allocation2 + $0x8] sm:$0xff] }
 0x4f2   :  { %v810_v12 = vmul.f32 1.442695, %v808_v8 }
 0x4f4   :  { %1108 = vpow2.f32 %v810_v12  ;;  %v1136_v12 = vld [vmem:[#allocation2 + $0x40] sm:$0xff] }
 0x4f6   :  { %v807_v54 = vpop.xlane.xlu1 %806 }
 0x4f7   :  { %v809_v55 = vsub.f32 %v800_v0, %v807_v54  ;;  %v1876_v43 = vpop.permute.xlu0 %630  ;;  %v1134_v0 = vld [vmem:[#allocation2] sm:$0xff] }
 0x4f8   :  { %v1893_v52 = vmul.f32 %v1132_v50, %v1876_v43  ;;  %v1896_v63 = vmul.f32 %v1133_v53, %v1876_v43  ;;  %v1140_v43 = vld [vmem:[#allocation2 + $0x60] sm:$0xff] }
 0x4f9   :  { %v812_v56 = vmul.f32 1.442695, %v809_v55  ;;  %v1137_v55 = vld [vmem:[#allocation2 + $0x48] sm:$0xff] }
 0x4fa   :  { %v626_v35 = vpop.permute.xlu1 %625 }
 0x4fb   :  { %1110 = vpow2.f32 %v812_v56  ;;  %v1898_v2 = vmul.f32 %v1134_v0, %v626_v35  ;;  %v1900_v8 = vmul.f32 %v1135_v7, %v626_v35 }
 0x4fe   :  { %v1109_v57 = vpop.eup %1108  ;;  %v646_v36 = vpop.permute.xlu1 %645 }
 0x4ff   :  { %v814_v11 = vsel %vm801_vm2, %v1109_v57, 0.0  ;;  %v1902_v54 = vmul.f32 %v1136_v12, %v646_v36  ;;  %v1904_v56 = vmul.f32 %v1137_v55, %v646_v36 }
 0x500   :  { %815 = vadd.xlane.f32.xlu0 %v814_v11 }
 0x502   :  { %v651_v37 = vpop.permute.xlu1 %650 }
 0x505   :  { %v1111_v40 = vpop.eup %1110 }
 0x506   :  { %v817_v38 = vsel %vm801_vm2, %v1111_v40, 0.0  ;;  %v656_v39 = vpop.permute.xlu1 %655 }
 0x507   :  { %818 = vadd.xlane.f32.xlu0 %v817_v38 }
 0x51d   :  { %635 = vperm.xlu0 %1058, %v1842_v47  }
 0x58d   :  { %v816_v51 = vpop.xlane.xlu0 %815 }
 0x58e   :  { %1112 = vrcp.f32 %v816_v51  ;;  %v1910_v51 = vmul.f32 %v1140_v43, %v656_v39 }
 0x594   :  { %v819_v1 = vpop.xlane.xlu0 %818 }
 0x595   :  { %1114 = vrcp.f32 %v819_v1  ;;  %v1141_v1 = vld [vmem:[#allocation2 + $0x68] sm:$0xff] }
 0x598   :  { %v1113_v58 = vpop.eup %1112 }
 0x599   :  { %v821_v59 = vmul.f32 %v1113_v58, %v1109_v57  ;;  %v1138_v57 = vld [vmem:[#allocation2 + $0x50] sm:$0xff]  ;;  %v1912_v58 = vmul.f32 %v1141_v1, %v656_v39 }
 0x59a   :  { %v1906_v11 = vmul.f32 %v1138_v57, %v651_v37 }
 0x59b   :  { %v831_v14 = vrot.slane %v821_v59, %v1790_v33  ;;  %v869_v30 = vmul.f32 %v868_v29, %v821_v59  ;;  %v1142_v59 = vld [vmem:[#allocation2 + $0x20] sm:$0xff] }
 0x59c   :  { %v636_v41 = vpop.permute.xlu0 %635 }
 0x59d   :  { %v837_v15 = vmul.f32 %v831_v14, %v825_v60  ;;  %v836_v17 = vmul.f32 %v831_v14, %v824_v13  ;;  %v838_v5 = vmul.f32 %v831_v14, %v826_v3  ;;  %v839_v22 = vmul.f32 %v831_v14, %v827_v6 }
 0x59e   :  { %v871_v32 = vsel %vm801_vm2, %v869_v30, 0.0 }
 0x59f   :  { %v1115_v61 = vpop.eup %1114  ;;  %v847_v18 = vsel %vm379_vm0, %v837_v15, 0.0  ;;  %v844_v9 = vsel %vm379_vm0, %v836_v17, 0.0  ;;  %v850_v20 = vsel %vm379_vm0, %v838_v5, 0.0  ;;  %v853_v25 = vsel %vm379_vm0, %v839_v22, 0.0 }
 0x5a0   :  { %v823_v47 = vmul.f32 %v1115_v61, %v1111_v40  ;;  %848 = vadd.xlane.f32.xlu0 %v847_v18  ;;  %845 = vadd.xlane.f32.xlu1 %v844_v9  ;;  %v1139_v40 = vld [vmem:[#allocation2 + $0x58] sm:$0xff] }
 0x5a1   :  { %v1908_v38 = vmul.f32 %v1139_v40, %v651_v37 }
 0x5a2   :  { %v835_v16 = vrot.slane %v823_v47, %v1790_v33  ;;  %v870_v31 = vmul.f32 %v868_v29, %v823_v47 }
 0x5a4   :  { %v841_v4 = vmul.f32 %v835_v16, %v825_v60  ;;  %v840_v27 = vmul.f32 %v835_v16, %v824_v13  ;;  %v842_v26 = vmul.f32 %v835_v16, %v826_v3  ;;  %v843_v21 = vmul.f32 %v835_v16, %v827_v6  ;;  %v1143_v13 = vld [vmem:[#allocation2 + $0x28] sm:$0xff]  ;;  %v1146_v6 = vld [vmem:[#allocation2 + $0x30] sm:$0xff] }
 0x5a5   :  { %v874_v34 = vsel %vm801_vm2, %v870_v31, 0.0  ;;  %v1914_v60 = vmul.f32 %v1142_v59, %v636_v41  ;;  %v1916_v14 = vmul.f32 %v1143_v13, %v636_v41 }
 0x5a6   :  { %v859_v28 = vsel %vm379_vm0, %v841_v4, 0.0  ;;  %v856_v24 = vsel %vm379_vm0, %v840_v27, 0.0  ;;  %v862_v19 = vsel %vm379_vm0, %v842_v26, 0.0  ;;  %v865_v23 = vsel %vm379_vm0, %v843_v21, 0.0  ;;  %v1145_v26 = vld [vmem:[#allocation2 + $0x78] sm:$0xff] }
 0x5a7   :  { %860 = vadd.xlane.f32.xlu0 %v859_v28  ;;  %857 = vadd.xlane.f32.xlu1 %v856_v24  ;;  %v1144_v28 = vld [vmem:[#allocation2 + $0x70] sm:$0xff] }
 0x5ab   :  { %863 = vadd.xlane.f32.xlu0 %v862_v19  ;;  %851 = vadd.xlane.f32.xlu1 %v850_v20  ;;  %v1147_v20 = vld [vmem:[#allocation2 + $0x38] sm:$0xff] }
 0x5af   :  { %866 = vadd.xlane.f32.xlu0 %v865_v23  ;;  %854 = vadd.xlane.f32.xlu1 %v853_v25 }
 0x5c0   :  { %660 = vperm.xlu1 %1059, %v1855_v10  }
 0x5c5   :  { %640 = vperm.xlu0 %1058, %v1848_v62  }
 0x5e4   :  { %872 = vadd.xlane.f32.xlu0 %v871_v32  ;;  %875 = vadd.xlane.f32.xlu1 %v874_v34 }
 0x62d   :  { %v846_v42 = vpop.xlane.xlu1 %845  ;;  %v849_v44 = vpop.xlane.xlu0 %848 }
 0x62e   :  { %v877_v61 = vmul.f32 %v846_v42, %v1898_v2  ;;  %v878_v18 = vmul.f32 %v846_v42, %v1900_v8  ;;  %v879_v9 = vmul.f32 %v849_v44, %v1893_v52  ;;  %v880_v47 = vmul.f32 %v849_v44, %v1896_v63 }
 0x630   :  { %v893_v30 = vadd.f32 %v879_v9, %v877_v61  ;;  %v902_v31 = vadd.f32 %v880_v47, %v878_v18 }
 0x634   :  { %v858_v45 = vpop.xlane.xlu1 %857  ;;  %v861_v10 = vpop.xlane.xlu0 %860 }
 0x635   :  { %v885_v16 = vmul.f32 %v858_v45, %v1902_v54  ;;  %v886_v3 = vmul.f32 %v858_v45, %v1904_v56  ;;  %v887_v4 = vmul.f32 %v861_v10, %v1906_v11  ;;  %v888_v27 = vmul.f32 %v861_v10, %v1908_v38 }
 0x637   :  { %v911_v32 = vadd.f32 %v887_v4, %v885_v16  ;;  %v920_v34 = vadd.f32 %v888_v27, %v886_v3 }
 0x638   :  { %v852_v46 = vpop.xlane.xlu1 %851  ;;  %v864_v62 = vpop.xlane.xlu0 %863 }
 0x639   :  { %v881_v22 = vmul.f32 %v852_v46, %v1914_v60  ;;  %v882_v23 = vmul.f32 %v852_v46, %v1916_v14  ;;  %v889_v25 = vmul.f32 %v864_v62, %v1910_v51  ;;  %v890_v29 = vmul.f32 %v864_v62, %v1912_v58 }
 0x63b   :  { %v894_v41 = vadd.f32 %v893_v30, %v881_v22  ;;  %v903_v42 = vadd.f32 %v902_v31, %v882_v23  ;;  %v912_v44 = vadd.f32 %v911_v32, %v889_v25  ;;  %v921_v45 = vadd.f32 %v920_v34, %v890_v29 }
 0x63c   :  { %v855_v48 = vpop.xlane.xlu1 %854  ;;  %v867_v49 = vpop.xlane.xlu0 %866 }
 0x640   :  { %v661_v15 = vpop.permute.xlu1 %660 }
 0x641   :  { %v1926_v24 = vmul.f32 %v1144_v28, %v661_v15  ;;  %v1928_v5 = vmul.f32 %v1145_v26, %v661_v15 }
 0x643   :  { %v891_v35 = vmul.f32 %v867_v49, %v1926_v24  ;;  %v892_v36 = vmul.f32 %v867_v49, %v1928_v5 }
 0x644   :  { %v641_v17 = vpop.permute.xlu0 %640 }
 0x645   :  { %v1930_v19 = vmul.f32 %v1146_v6, %v641_v17  ;;  %v1932_v21 = vmul.f32 %v1147_v20, %v641_v17  ;;  %v913_v10 = vadd.f32 %v912_v44, %v891_v35  ;;  %v922_v46 = vadd.f32 %v921_v45, %v892_v36 }
 0x647   :  { %v883_v37 = vmul.f32 %v855_v48, %v1930_v19  ;;  %v884_v39 = vmul.f32 %v855_v48, %v1932_v21  ;;  %v914_v53 = vrot.slane %v913_v10, 4  ;;  %v923_v0 = vrot.slane %v922_v46, 4 }
 0x649   :  { %v895_v50 = vadd.f32 %v894_v41, %v883_v37  ;;  %v904_v62 = vadd.f32 %v903_v42, %v884_v39  ;;  %v915_v55 = vadd.f32 %v914_v53, %v913_v10  ;;  %v924_v57 = vadd.f32 %v923_v0, %v922_v46 }
 0x64b   :  { %v896_v7 = vrot.slane %v895_v50, 4  ;;  %v905_v12 = vrot.slane %v904_v62, 4  ;;  %v916_v43 = vrot.slane %v915_v55, 2  ;;  %v925_v1 = vrot.slane %v924_v57, 2 }
 0x64d   :  { %v897_v40 = vadd.f32 %v896_v7, %v895_v50  ;;  %v906_v49 = vadd.f32 %v905_v12, %v904_v62  ;;  %v917_v13 = vadd.f32 %v916_v43, %v915_v55  ;;  %v926_v15 = vadd.f32 %v925_v1, %v924_v57 }
 0x64f   :  { %v898_v59 = vrot.slane %v897_v40, 2  ;;  %v907_v48 = vrot.slane %v906_v49, 2  ;;  %v918_v18 = vrot.slane %v917_v13, 1  ;;  %v927_v9 = vrot.slane %v926_v15, 1 }
 0x651   :  { %v899_v17 = vadd.f32 %v898_v59, %v897_v40  ;;  %v908_v61 = vadd.f32 %v907_v48, %v906_v49  ;;  %v919_v3 = vadd.f32 %v918_v18, %v917_v13  ;;  %v928_v4 = vadd.f32 %v927_v9, %v926_v15 }
 0x653   :  { %v900_v47 = vrot.slane %v899_v17, 1  ;;  %v909_v16 = vrot.slane %v908_v61, 1 }
 0x655   :  { %v901_v27 = vadd.f32 %v900_v47, %v899_v17  ;;  %v910_v28 = vadd.f32 %v909_v16, %v908_v61 }
 0x671   :  { %v876_v26 = vpop.xlane.xlu1 %875  ;;  %v873_v6 = vpop.xlane.xlu0 %872 }
 0x672   :  { %v931_v20 = vadd.f32 %v919_v3, %v876_v26  ;;  %v932_v22 = vadd.f32 %v928_v4, %v876_v26  ;;  %v929_v23 = vadd.f32 %v901_v27, %v873_v6  ;;  %v930_v25 = vadd.f32 %v910_v28, %v873_v6 }
 0x674   :  { %v1038_v29 = vmul.f32 -1.442695, %v931_v20  ;;  %v1039_v30 = vmul.f32 -1.442695, %v932_v22  ;;  %v1036_v31 = vmul.f32 -1.442695, %v929_v23 }
 0x675   :  { %v1037_v32 = vmul.f32 -1.442695, %v930_v25 }
 0x676   :  { %1116 = vpow2.f32 %v1038_v29 }
 0x677   :  { %1118 = vpow2.f32 %v1039_v30 }
 0x678   :  { %1120 = vpow2.f32 %v1036_v31 }
 0x679   :  { %1122 = vpow2.f32 %v1037_v32 }
 0x680   :  { %v1117_v34 = vpop.eup %1116 }
 0x681   :  { %v1119_v35 = vpop.eup %1118  ;;  %v947_v36 = vadd.f32 1.0, %v1117_v34 }
 0x682   :  { %v1121_v37 = vpop.eup %1120  ;;  %v948_v39 = vadd.f32 1.0, %v1119_v35 }
 0x683   :  { %v1123_v41 = vpop.eup %1122  ;;  %1124 = vrcp.f32 %v947_v36  ;;  %v945_v42 = vadd.f32 1.0, %v1121_v37 }
 0x684   :  { %1126 = vrcp.f32 %v948_v39  ;;  %v946_v44 = vadd.f32 1.0, %v1123_v41 }
 0x685   :  { %1128 = vrcp.f32 %v945_v42 }
 0x686   :  { %1130 = vrcp.f32 %v946_v44 }
 0x68d   :  { %v1125_v45 = vpop.eup %1124 }
 0x68e   :  { %v1127_v10 = vpop.eup %1126  ;;  %v968_v46 = vrot.slane %v1125_v45, %v1790_v33 }
 0x68f   :  { %v1129_v50 = vpop.eup %1128  ;;  %v972_v62 = vrot.slane %v1127_v10, %v1790_v33 }
 0x690   :  { %v1131_v53 = vpop.eup %1130  ;;  %v981_v0 = vmul.f32 %v968_v46, %v1902_v54  ;;  %v983_v7 = vmul.f32 %v968_v46, %v1906_v11  ;;  %v985_v12 = vmul.f32 %v968_v46, %v1910_v51  ;;  %v987_v55 = vmul.f32 %v968_v46, %v1926_v24 }
 0x691   :  { %v982_v57 = vmul.f32 %v972_v62, %v1904_v56  ;;  %v984_v40 = vmul.f32 %v972_v62, %v1908_v38  ;;  %v986_v49 = vmul.f32 %v972_v62, %v1912_v58  ;;  %v988_v43 = vmul.f32 %v972_v62, %v1928_v5 }
 0x692   :  { %997 = vst [vmem:[#allocation22 + $0x40] sm:$0xff] %v981_v0  ;;  %999 = vst [vmem:[#allocation22 + $0x50] sm:$0xff] %v983_v7  ;;  %v960_v54 = vrot.slane %v1129_v50, %v1790_v33  ;;  %v964_v11 = vrot.slane %v1131_v53, %v1790_v33 }
 0x693   :  { %1001 = vst [vmem:[#allocation22 + $0x60] sm:$0xff] %v985_v12  ;;  %1003 = vst [vmem:[#allocation22 + $0x70] sm:$0xff] %v987_v55 }
 0x694   :  { %998 = vst [vmem:[#allocation22 + $0x48] sm:$0xff] %v982_v57  ;;  %1000 = vst [vmem:[#allocation22 + $0x58] sm:$0xff] %v984_v40  ;;  %v973_v56 = vmul.f32 %v960_v54, %v1898_v2  ;;  %v974_v38 = vmul.f32 %v964_v11, %v1900_v8  ;;  %v975_v51 = vmul.f32 %v960_v54, %v1893_v52 }
 0x695   :  { %1002 = vst [vmem:[#allocation22 + $0x68] sm:$0xff] %v986_v49  ;;  %1004 = vst [vmem:[#allocation22 + $0x78] sm:$0xff] %v988_v43  ;;  %v976_v58 = vmul.f32 %v964_v11, %v1896_v63  ;;  %v977_v24 = vmul.f32 %v960_v54, %v1914_v60  ;;  %v978_v5 = vmul.f32 %v964_v11, %v1916_v14 }
 0x696   :  { %v979_v33 = vmul.f32 %v960_v54, %v1930_v19  ;;  %v980_v1 = vmul.f32 %v964_v11, %v1932_v21  ;;  %989 = vst [vmem:[#allocation22] sm:$0xff] %v973_v56  ;;  %990 = vst [vmem:[#allocation22 + $0x8] sm:$0xff] %v974_v38 }
 0x697   :  { %991 = vst [vmem:[#allocation22 + $0x10] sm:$0xff] %v975_v51  ;;  %992 = vst [vmem:[#allocation22 + $0x18] sm:$0xff] %v976_v58 }
 0x698   :  { %993 = vst [vmem:[#allocation22 + $0x20] sm:$0xff] %v977_v24  ;;  %994 = vst [vmem:[#allocation22 + $0x28] sm:$0xff] %v978_v5 }
 0x699   :  { %995 = vst [vmem:[#allocation22 + $0x30] sm:$0xff] %v979_v33  ;;  %996 = vst [vmem:[#allocation22 + $0x38] sm:$0xff] %v980_v1 }
 0x69a   :  { %1423 = shalt.err (!%p1420_p2)
}
 0x69b   :  { %s1424_s16 = scalar_lea.hbm %s1989_s12, 2048 }
 0x69c   :  { %p1425_p3 = scmp.ne.s32.totalorder %s1989_s12, %s1424_s16  ;;  %p1428_p4 = scmp.lt.u32.totalorder %s1424_s16, %s1989_s12 }
 0x69e   :  { %p1430_p5 = pnand %p1428_p4, %p1425_p3 }
 0x6a0   :  { %1433 = shalt.err (!%p1430_p5)
}
 0x6a1   :  { %1016 = dma.vmem_to_hbm [thread:$0]  %s1011_s14, 2048, %s1989_s12, [#allocation4], %s1458_s9, %s1458_s9, %s1459_s1  }
 0x6a2   :  { %1448 = dma.done.wait [#allocation4], 2048  }
 0x6a3   :  { %1449 = vsyncadd [#allocation4], 4294965248 }
 0x6a4   :  { %1020 = vsyncpa [#allocation3], 1 }
 0x6a5   :  { %1021 = vsyncpa [#allocation6], 1 }
 0x6a6   :  { %1022 = vsyncpa [#allocation9], 1 }
 0x6a7   :  { %1023 = vsyncpa [#allocation12], 1 }
 0x6a8   :  { %1024 = vsyncpa [#allocation15], 1 }
 0x6a9   :  { %1025 = vsyncpa [#allocation18], 1 }
 0x6aa   :  { %1026 = vsyncpa [#allocation21], 1 }
 0x6ab   :  { %1027 = vsyncpa [#allocation4], 1 }

</bundles_post_ra>
